<compile_context>
chip_gen: v6e
topology: v6e:2x2x1
jax: 0.10.0
libtpu: 0.0.40
codegen_flags: <defaults>
</compile_context>

<pallas_src>
import functools

import jax
import jax.numpy as jnp
from jax.experimental import pallas as pl
from jax.experimental.pallas import tpu as pltpu


def _bottleneck_kernel(x_ref, w1_ref, b1_ref, w2_ref, b2_ref, w3_ref, b3_ref,
                       out_ref, *, k, stride, H, W):
    """One image per grid step.

    x_ref : (1, Cin, H*W) f32, Cin == 4*planes (downsample=None path)
    w1_ref: (P, Cin)        bf16, BN1 scale folded in
    w2_ref: (P, k*k*P)      bf16, BN2 scale folded in (im2col-flattened kxk)
    w3_ref: (4P, P)         bf16, BN3 scale folded in
    b*_ref: (C, 1)          f32 per-output-channel shifts
    out   : (1, 4P, Ho*Wo)  f32 (lane-dense spatial axis)
    """
    x = x_ref[0]                                   # (Cin, H*W) f32
    Cin = x.shape[0]
    P = w1_ref.shape[0]
    Ho = (H - k) // stride + 1
    Wo = (W - k) // stride + 1

    # ---- conv1 (1x1, BN folded) + relu : (P,Cin)@(Cin,HW) -> (P,HW) --------
    y1 = jnp.dot(w1_ref[...], x.astype(jnp.bfloat16),
                 preferred_element_type=jnp.float32)
    y1 = jnp.maximum(y1 + b1_ref[...], 0.0)

    # ---- conv2 (kxk, VALID, stride, BN folded) + relu via one im2col dot ---
    y1_hw = y1.reshape(P, H, W)
    cols = []
    for dy in range(k):
        for dx in range(k):
            patch = jax.lax.slice(
                y1_hw,
                (0, dy, dx),
                (P, dy + (Ho - 1) * stride + 1, dx + (Wo - 1) * stride + 1),
                (1, stride, stride))
            cols.append(patch.reshape(P, Ho * Wo))
    col = jnp.concatenate(cols, axis=0).astype(jnp.bfloat16)   # (k*k*P, Ho*Wo)
    y2 = jnp.dot(w2_ref[...], col, preferred_element_type=jnp.float32)
    y2 = jnp.maximum(y2 + b2_ref[...], 0.0)                    # (P, Ho*Wo)

    # ---- conv3 (1x1, BN folded) : (4P,P)@(P,Ho*Wo) -------------------------
    y3 = jnp.dot(w3_ref[...], y2.astype(jnp.bfloat16),
                 preferred_element_type=jnp.float32)
    y3 = y3 + b3_ref[...]

    # ---- residual crop (downsample=None -> residual == x) + add + relu -----
    res = jax.lax.slice(x.reshape(Cin, H, W), (0, 0, 0), (Cin, Ho, Wo))
    out_ref[0] = jnp.maximum(y3 + res.reshape(Cin, Ho * Wo), 0.0)


def bottleneck_forward(x_nchw, params, *, kernel_size, stride):
    """Fused Bottleneck forward.  Takes and returns NCHW; no transposes."""
    x_nchw = x_nchw.astype(jnp.float32)
    N, Cin, H, W = x_nchw.shape
    w1, s1, b1, w2, s2, b2, w3, s3, b3 = params
    P = w1.shape[1]
    assert Cin == 4 * P, "downsample=None requires inplanes == planes * 4"
    k = kernel_size
    Ho = (H - k) // stride + 1
    Wo = (W - k) // stride + 1

    # Fold BN scales into the conv weights (eval-mode BN), transpose so output
    # channels are rows and the contraction dim is columns, cast to bf16 for
    # the MXU.  Biases remain f32 (epilogue stays f32).
    w1k = jnp.transpose(w1 * s1).astype(jnp.bfloat16)                    # (P, Cin)
    w2k = jnp.transpose((w2 * s2).reshape(k * k * P, P)).astype(jnp.bfloat16)  # (P, k*k*P)
    w3k = jnp.transpose(w3 * s3).astype(jnp.bfloat16)                    # (4P, P)
    b1k = b1.reshape(P, 1).astype(jnp.float32)
    b2k = b2.reshape(P, 1).astype(jnp.float32)
    b3k = b3.reshape(4 * P, 1).astype(jnp.float32)

    # Free, contiguous reshape: lane-dense spatial axis for the kernel.
    x_flat = x_nchw.reshape(N, Cin, H * W)

    kern = functools.partial(_bottleneck_kernel, k=k, stride=stride, H=H, W=W)

    out = pl.pallas_call(
        kern,
        out_shape=jax.ShapeDtypeStruct((N, 4 * P, Ho * Wo), jnp.float32),
        grid_spec=pltpu.PrefetchScalarGridSpec(
            num_scalar_prefetch=0,
            grid=(N,),                       # N=2 -> both v7x TensorCores busy
            in_specs=[
                pl.BlockSpec((1, Cin, H * W), lambda n: (n, 0, 0)),
                pl.BlockSpec((P, Cin), lambda n: (0, 0)),
                pl.BlockSpec((P, 1), lambda n: (0, 0)),
                pl.BlockSpec((P, k * k * P), lambda n: (0, 0)),
                pl.BlockSpec((P, 1), lambda n: (0, 0)),
                pl.BlockSpec((4 * P, P), lambda n: (0, 0)),
                pl.BlockSpec((4 * P, 1), lambda n: (0, 0)),
            ],
            out_specs=pl.BlockSpec((1, 4 * P, Ho * Wo), lambda n: (n, 0, 0)),
        ),
        compiler_params=pltpu.CompilerParams(dimension_semantics=("parallel",)),
    )(x_flat, w1k, b1k, w2k, b2k, w3k, b3k)

    # Output is already channel-major; reshape (free) to NCHW.
    return out.reshape(N, 4 * P, Ho, Wo)


def _fold_bn(gamma, beta, mean, var, eps=1e-5):
    """Eval-mode BatchNorm folded to per-channel scale/shift, shaped (1, C)."""
    scale = gamma / jnp.sqrt(var + eps)
    shift = beta - mean * scale
    return scale[None, :], shift[None, :]


def _reference(x_nchw, params, *, kernel_size, stride):
    """Independent pure-JAX f32 reference (uses lax.conv for conv2)."""
    w1, s1, b1, w2, s2, b2, w3, s3, b3 = params
    x = jnp.transpose(x_nchw, (0, 2, 3, 1))
    y1 = jnp.maximum(jnp.einsum('nhwc,cp->nhwp', x, w1) * s1 + b1, 0.0)
    y2 = jax.lax.conv_general_dilated(
        y1, w2, window_strides=(stride, stride), padding='VALID',
        dimension_numbers=('NHWC', 'HWIO', 'NHWC'))
    y2 = jnp.maximum(y2 * s2 + b2, 0.0)
    y3 = jnp.einsum('nhwp,pq->nhwq', y2, w3) * s3 + b3
    Ho, Wo = y3.shape[1], y3.shape[2]
    res = x[:, :Ho, :Wo, :]
    out = jnp.maximum(y3 + res, 0.0)
    return jnp.transpose(out, (0, 3, 1, 2))


if __name__ == "__main__":
    # Module config: Bottleneck(inplanes=16, planes=4, stride=1,
    #                           downsample=None, kernel_size=3)
    # downsample=None -> inplanes must equal planes * expansion(=4).
    N, inplanes, H, W = 2, 16, 16, 16
    planes, kernel_size, stride = 4, 3, 1

    key = jax.random.PRNGKey(0)
    ks = jax.random.split(key, 16)

    x_nchw = jax.random.normal(ks[0], (N, inplanes, H, W), jnp.float32)

    # Conv weights (1x1 convs as (Cin, Cout) matrices, kxk conv as HWIO).
    w1 = jax.random.normal(ks[1], (inplanes, planes), jnp.float32) * 0.1
    w2 = jax.random.normal(ks[2], (kernel_size, kernel_size, planes, planes),
                           jnp.float32) * 0.1
    w3 = jax.random.normal(ks[3], (planes, 4 * planes), jnp.float32) * 0.1

    # BatchNorm params (eval-mode semantics; deterministic, non-trivial).
    def bn_params(kg, kb, km, kv, c):
        gamma = 0.5 + jax.random.uniform(kg, (c,), jnp.float32)
        beta = 0.1 * jax.random.normal(kb, (c,), jnp.float32)
        mean = 0.1 * jax.random.normal(km, (c,), jnp.float32)
        var = 0.5 + jax.random.uniform(kv, (c,), jnp.float32)
        return gamma, beta, mean, var

    s1, b1 = _fold_bn(*bn_params(ks[4], ks[5], ks[6], ks[7], planes))
    s2, b2 = _fold_bn(*bn_params(ks[8], ks[9], ks[10], ks[11], planes))
    s3, b3 = _fold_bn(*bn_params(ks[12], ks[13], ks[14], ks[15], 4 * planes))

    params = (w1, s1, b1, w2, s2, b2, w3, s3, b3)

    out = bottleneck_forward(x_nchw, params,
                             kernel_size=kernel_size, stride=stride)
    out = jax.block_until_ready(out)

    ref = _reference(x_nchw, params, kernel_size=kernel_size, stride=stride)
    assert out.shape == (N, 4 * planes, H - kernel_size + 1, W - kernel_size + 1)
    # bf16 matmul operands (f32 accumulation) -> slightly relaxed tolerance.
    assert jnp.allclose(out, ref, atol=3e-2, rtol=3e-2), "mismatch vs reference"

    print("KERNEL_OK")
</pallas_src>

<mosaic_0001>
module attributes {stable_mosaic.version = 11 : i64} {
  func.func @_bottleneck_kernel(%arg0: i32, %arg1: memref<1x16x256xf32, #tpu.memory_space<vmem>>, %arg2: memref<4x16xbf16, #tpu.memory_space<vmem>>, %arg3: memref<4x1xf32, #tpu.memory_space<vmem>>, %arg4: memref<4x36xbf16, #tpu.memory_space<vmem>>, %arg5: memref<4x1xf32, #tpu.memory_space<vmem>>, %arg6: memref<16x4xbf16, #tpu.memory_space<vmem>>, %arg7: memref<16x1xf32, #tpu.memory_space<vmem>>, %arg8: memref<1x16x196xf32, #tpu.memory_space<vmem>>) attributes {dimension_semantics = [#tpu.dimension_semantics<parallel>], iteration_bounds = array<i64: 2>, scalar_prefetch = 0 : i64, scratch_operands = 0 : i64, tpu.core_type = #tpu.core_type<tc>, window_params = [{transform_indices = @transform_0, window_bounds = array<i64: 1, 16, 256>}, {pipeline_mode = #tpu.pipeline_mode<synchronous>, transform_indices = @transform_1, window_bounds = array<i64: 4, 16>}, {pipeline_mode = #tpu.pipeline_mode<synchronous>, transform_indices = @transform_2, window_bounds = array<i64: 4, 1>}, {pipeline_mode = #tpu.pipeline_mode<synchronous>, transform_indices = @transform_3, window_bounds = array<i64: 4, 36>}, {pipeline_mode = #tpu.pipeline_mode<synchronous>, transform_indices = @transform_4, window_bounds = array<i64: 4, 1>}, {pipeline_mode = #tpu.pipeline_mode<synchronous>, transform_indices = @transform_5, window_bounds = array<i64: 16, 4>}, {pipeline_mode = #tpu.pipeline_mode<synchronous>, transform_indices = @transform_6, window_bounds = array<i64: 16, 1>}, {transform_indices = @transform_7, window_bounds = array<i64: 1, 16, 196>}]} {
    %c0 = arith.constant 0 : index
    %c0_0 = arith.constant 0 : index
    %c0_1 = arith.constant 0 : index
    %0 = vector.load %arg1[%c0, %c0_0, %c0_1] : memref<1x16x256xf32, #tpu.memory_space<vmem>>, vector<1x16x256xf32>
    %1 = vector.shape_cast %0 : vector<1x16x256xf32> to vector<16x256xf32>
    %c0_2 = arith.constant 0 : index
    %c0_3 = arith.constant 0 : index
    %2 = vector.load %arg2[%c0_2, %c0_3] : memref<4x16xbf16, #tpu.memory_space<vmem>>, vector<4x16xbf16>
    %3 = arith.truncf %1 : vector<16x256xf32> to vector<16x256xbf16>
    %cst = arith.constant dense<0.000000e+00> : vector<4x256xf32>
    %4 = tpu.matmul %2, %3, %cst {dimension_numbers = #tpu.dot_dimension_numbers<[1], [0], [0], [1], [0, 0, 1, 1], [], []>} : vector<4x16xbf16>, vector<16x256xbf16>, vector<4x256xf32> -> vector<4x256xf32>
    %c0_4 = arith.constant 0 : index
    %c0_5 = arith.constant 0 : index
    %5 = vector.load %arg3[%c0_4, %c0_5] : memref<4x1xf32, #tpu.memory_space<vmem>>, vector<4x1xf32>
    %6 = vector.broadcast %5 : vector<4x1xf32> to vector<4x256xf32>
    %7 = arith.addf %4, %6 : vector<4x256xf32>
    %cst_6 = arith.constant 0.000000e+00 : f32
    %8 = vector.broadcast %cst_6 : f32 to vector<4x256xf32>
    %9 = arith.maximumf %7, %8 : vector<4x256xf32>
    %10 = vector.shape_cast %9 : vector<4x256xf32> to vector<4x16x16xf32>
    %11 = vector.extract_strided_slice %10 {offsets = [0, 0, 0], sizes = [4, 14, 14], strides = [1, 1, 1]} : vector<4x16x16xf32> to vector<4x14x14xf32>
    %12 = vector.shape_cast %11 : vector<4x14x14xf32> to vector<4x196xf32>
    %13 = vector.extract_strided_slice %10 {offsets = [0, 0, 1], sizes = [4, 14, 14], strides = [1, 1, 1]} : vector<4x16x16xf32> to vector<4x14x14xf32>
    %14 = vector.shape_cast %13 : vector<4x14x14xf32> to vector<4x196xf32>
    %15 = vector.extract_strided_slice %10 {offsets = [0, 0, 2], sizes = [4, 14, 14], strides = [1, 1, 1]} : vector<4x16x16xf32> to vector<4x14x14xf32>
    %16 = vector.shape_cast %15 : vector<4x14x14xf32> to vector<4x196xf32>
    %17 = vector.extract_strided_slice %10 {offsets = [0, 1, 0], sizes = [4, 14, 14], strides = [1, 1, 1]} : vector<4x16x16xf32> to vector<4x14x14xf32>
    %18 = vector.shape_cast %17 : vector<4x14x14xf32> to vector<4x196xf32>
    %19 = vector.extract_strided_slice %10 {offsets = [0, 1, 1], sizes = [4, 14, 14], strides = [1, 1, 1]} : vector<4x16x16xf32> to vector<4x14x14xf32>
    %20 = vector.shape_cast %19 : vector<4x14x14xf32> to vector<4x196xf32>
    %21 = vector.extract_strided_slice %10 {offsets = [0, 1, 2], sizes = [4, 14, 14], strides = [1, 1, 1]} : vector<4x16x16xf32> to vector<4x14x14xf32>
    %22 = vector.shape_cast %21 : vector<4x14x14xf32> to vector<4x196xf32>
    %23 = vector.extract_strided_slice %10 {offsets = [0, 2, 0], sizes = [4, 14, 14], strides = [1, 1, 1]} : vector<4x16x16xf32> to vector<4x14x14xf32>
    %24 = vector.shape_cast %23 : vector<4x14x14xf32> to vector<4x196xf32>
    %25 = vector.extract_strided_slice %10 {offsets = [0, 2, 1], sizes = [4, 14, 14], strides = [1, 1, 1]} : vector<4x16x16xf32> to vector<4x14x14xf32>
    %26 = vector.shape_cast %25 : vector<4x14x14xf32> to vector<4x196xf32>
    %27 = vector.extract_strided_slice %10 {offsets = [0, 2, 2], sizes = [4, 14, 14], strides = [1, 1, 1]} : vector<4x16x16xf32> to vector<4x14x14xf32>
    %28 = vector.shape_cast %27 : vector<4x14x14xf32> to vector<4x196xf32>
    %29 = tpu.concatenate %12, %14, %16, %18, %20, %22, %24, %26, %28 in 0 : vector<4x196xf32>, vector<4x196xf32>, vector<4x196xf32>, vector<4x196xf32>, vector<4x196xf32>, vector<4x196xf32>, vector<4x196xf32>, vector<4x196xf32>, vector<4x196xf32> -> vector<36x196xf32>
    %30 = arith.truncf %29 : vector<36x196xf32> to vector<36x196xbf16>
    %c0_7 = arith.constant 0 : index
    %c0_8 = arith.constant 0 : index
    %31 = vector.load %arg4[%c0_7, %c0_8] : memref<4x36xbf16, #tpu.memory_space<vmem>>, vector<4x36xbf16>
    %cst_9 = arith.constant dense<0.000000e+00> : vector<4x196xf32>
    %32 = tpu.matmul %31, %30, %cst_9 {dimension_numbers = #tpu.dot_dimension_numbers<[1], [0], [0], [1], [0, 0, 1, 1], [], []>} : vector<4x36xbf16>, vector<36x196xbf16>, vector<4x196xf32> -> vector<4x196xf32>
    %c0_10 = arith.constant 0 : index
    %c0_11 = arith.constant 0 : index
    %33 = vector.load %arg5[%c0_10, %c0_11] : memref<4x1xf32, #tpu.memory_space<vmem>>, vector<4x1xf32>
    %34 = vector.broadcast %33 : vector<4x1xf32> to vector<4x196xf32>
    %35 = arith.addf %32, %34 : vector<4x196xf32>
    %cst_12 = arith.constant 0.000000e+00 : f32
    %36 = vector.broadcast %cst_12 : f32 to vector<4x196xf32>
    %37 = arith.maximumf %35, %36 : vector<4x196xf32>
    %c0_13 = arith.constant 0 : index
    %c0_14 = arith.constant 0 : index
    %38 = vector.load %arg6[%c0_13, %c0_14] : memref<16x4xbf16, #tpu.memory_space<vmem>>, vector<16x4xbf16>
    %39 = arith.truncf %37 : vector<4x196xf32> to vector<4x196xbf16>
    %cst_15 = arith.constant dense<0.000000e+00> : vector<16x196xf32>
    %40 = tpu.matmul %38, %39, %cst_15 {dimension_numbers = #tpu.dot_dimension_numbers<[1], [0], [0], [1], [0, 0, 1, 1], [], []>} : vector<16x4xbf16>, vector<4x196xbf16>, vector<16x196xf32> -> vector<16x196xf32>
    %c0_16 = arith.constant 0 : index
    %c0_17 = arith.constant 0 : index
    %41 = vector.load %arg7[%c0_16, %c0_17] : memref<16x1xf32, #tpu.memory_space<vmem>>, vector<16x1xf32>
    %42 = vector.broadcast %41 : vector<16x1xf32> to vector<16x196xf32>
    %43 = arith.addf %40, %42 : vector<16x196xf32>
    %44 = vector.shape_cast %1 : vector<16x256xf32> to vector<16x16x16xf32>
    %45 = vector.extract_strided_slice %44 {offsets = [0, 0, 0], sizes = [16, 14, 14], strides = [1, 1, 1]} : vector<16x16x16xf32> to vector<16x14x14xf32>
    %46 = vector.shape_cast %45 : vector<16x14x14xf32> to vector<16x196xf32>
    %47 = arith.addf %43, %46 : vector<16x196xf32>
    %cst_18 = arith.constant 0.000000e+00 : f32
    %48 = vector.broadcast %cst_18 : f32 to vector<16x196xf32>
    %49 = arith.maximumf %47, %48 : vector<16x196xf32>
    %c0_19 = arith.constant 0 : index
    %c0_20 = arith.constant 0 : index
    %c0_21 = arith.constant 0 : index
    %50 = vector.load %arg8[%c0_19, %c0_20, %c0_21] : memref<1x16x196xf32, #tpu.memory_space<vmem>>, vector<1x16x196xf32>
    %51 = vector.shape_cast %50 : vector<1x16x196xf32> to vector<16x196xf32>
    %52 = vector.shape_cast %49 : vector<16x196xf32> to vector<1x16x196xf32>
    tpu.vector_store %arg8[%c0_19, %c0_20, %c0_21], %52 {strides = array<i32>} : memref<1x16x196xf32, #tpu.memory_space<vmem>>, vector<1x16x196xf32>,
    return
  }
  func.func @transform_0(%arg0: i32) -> (i32, i32, i32) {
    %c0_i32 = arith.constant 0 : i32
    %c0_i32_0 = arith.constant 0 : i32
    %c0_i32_1 = arith.constant 0 : i32
    return %arg0, %c0_i32, %c0_i32_0 : i32, i32, i32
  }
  func.func @transform_1(%arg0: i32) -> (i32, i32) {
    %c0_i32 = arith.constant 0 : i32
    %c0_i32_0 = arith.constant 0 : i32
    %c0_i32_1 = arith.constant 0 : i32
    return %c0_i32, %c0_i32_0 : i32, i32
  }
  func.func @transform_2(%arg0: i32) -> (i32, i32) {
    %c0_i32 = arith.constant 0 : i32
    %c0_i32_0 = arith.constant 0 : i32
    %c0_i32_1 = arith.constant 0 : i32
    return %c0_i32, %c0_i32_0 : i32, i32
  }
  func.func @transform_3(%arg0: i32) -> (i32, i32) {
    %c0_i32 = arith.constant 0 : i32
    %c0_i32_0 = arith.constant 0 : i32
    %c0_i32_1 = arith.constant 0 : i32
    return %c0_i32, %c0_i32_0 : i32, i32
  }
  func.func @transform_4(%arg0: i32) -> (i32, i32) {
    %c0_i32 = arith.constant 0 : i32
    %c0_i32_0 = arith.constant 0 : i32
    %c0_i32_1 = arith.constant 0 : i32
    return %c0_i32, %c0_i32_0 : i32, i32
  }
  func.func @transform_5(%arg0: i32) -> (i32, i32) {
    %c0_i32 = arith.constant 0 : i32
    %c0_i32_0 = arith.constant 0 : i32
    %c0_i32_1 = arith.constant 0 : i32
    return %c0_i32, %c0_i32_0 : i32, i32
  }
  func.func @transform_6(%arg0: i32) -> (i32, i32) {
    %c0_i32 = arith.constant 0 : i32
    %c0_i32_0 = arith.constant 0 : i32
    %c0_i32_1 = arith.constant 0 : i32
    return %c0_i32, %c0_i32_0 : i32, i32
  }
  func.func @transform_7(%arg0: i32) -> (i32, i32, i32) {
    %c0_i32 = arith.constant 0 : i32
    %c0_i32_0 = arith.constant 0 : i32
    %c0_i32_1 = arith.constant 0 : i32
    return %arg0, %c0_i32, %c0_i32_0 : i32, i32, i32
  }
}

</mosaic_0001>

<bundles_post_ra>
// kernel: tpu_custom_call.1
= control target key start
LH: loop header
LB: loop body
LE: loop exit
PB: predicated region body
PF: predicated region fallthrough
CT: control target
= control target key end

     0   :  { %12 = vsyncpa [#allocation3], 0  ;;  %s6394_s0 = inlined_call_operand.hbm [shape: f32[2,16,256], index: 0, kind: input, shape index: {}]   ;;  %s6395_s1 = inlined_call_operand.vmem [shape: bf16[4,16], index: 1, kind: input, shape index: {}]   ;;  %s6396_s2 = inlined_call_operand.vmem [shape: f32[4,1], index: 2, kind: input, shape index: {}]   ;;  %s6397_s3 = inlined_call_operand.vmem [shape: bf16[4,36], index: 3, kind: input, shape index: {}]   ;;  %s6398_s4 = inlined_call_operand.vmem [shape: f32[4,1], index: 4, kind: input, shape index: {}]   ;;  %s6399_s5 = inlined_call_operand.vmem [shape: bf16[16,4], index: 5, kind: input, shape index: {}]   ;;  %s6400_s6 = inlined_call_operand.vmem [shape: f32[16,1], index: 6, kind: input, shape index: {}]   ;;  %s6401_s7 = inlined_call_operand.hbm [shape: f32[2,16,196], index: 7, kind: output, shape index: {}]  }
   0x1   :  { %14 = vsyncpa [#allocation3 + $0x1], 0 }
   0x2   :  { %15 = vsyncpa [#allocation4], 0 }
   0x3   :  { %17 = vsyncpa [#allocation4 + $0x1], 0  ;;  %s4582_s24 = smov 0   ;;  %s4584_s25 = smov 0  }
   0x4   :  { %s4586_s26 = smov 0   ;;  %s4588_s27 = smov 0  }
   0x5 LB: > { %s4603_s28 = sadd.s32 4294967295, %s4511_s27   ;;  %s4017_s29 = sadd.s32 4294967294, %s4511_s27   ;;  %s4511_s27 = sphi %s4588_s27, %s6510_s27   ;;  %s4507_s26 = sphi %s4586_s26, %s6509_s26   ;;  %s4503_s25 = sphi %s4584_s25, %s6508_s25   ;;  %s4499_s24 = sphi %s4582_s24, %s6507_s24  }
   0x6   : > { %s4607_s30 = sadd.s32 1, %s4511_s27   ;;  %s30_s8 = sadd.s32 1, %s4507_s26 }
   0x7   : > { %s27_s9 = ssub.s32 %s4511_s27, %s4607_s30  ;;  %p37_p0 = scmp.ne.s32.totalorder %s4507_s26, %s4503_s25 }
   0x8   : > { %p28_p1 = scmp.eq.s32.totalorder %s27_s9, 0  ;;  %p38_p2 = scmp.eq.s32.totalorder %s4511_s27, 0 }
   0x9   : > { %p43_p3 = scmp.ne.s32.totalorder %s4503_s25, %s4499_s24  ;;  %p44_p4 = scmp.eq.s32.totalorder %s4603_s28, 0 }
   0xa   : > { %s4619_s10 = scalar_select %p28_p1, %s4507_s26, %s30_s8  }
   0xb   : > { %p4621_p5 = por %p38_p2, %p37_p0  ;;  %p4625_p6 = por %p44_p4, %p43_p3 }
   0xc   : > { %p193_p7 = scmp.eq.s32.totalorder %s4603_s28, 1  ;;  %p199_p8 = scmp.eq.s32.totalorder %s4017_s29, 1 }
   0xd   : > { %s6449_s12 = scalar_select %p4625_p6, 1, 0 }
   0xe   : > { %p4091_p10 = scmp.lt.s32.totalorder %s4511_s27, 2  ;;  %p4632_p11 = por %p193_p7, %p37_p0 }
   0xf   : > { %p4636_p12 = por %p199_p8, %p43_p3  ;;  %s237_s15 = sand.u32 1, %s4507_s26  }
  0x10   : > { %s6450_s13 = scalar_select %p4632_p11, 1, 0 }
  0x11   : > { %s6451_s14 = scalar_select %p4636_p12, 1, 0 }
  0x12   : > { %s4077_s16 = sshll.u32 %s4511_s27, 9  ;;  %s4020_s17 = sshll.u32 %s237_s15, 5 }
  0x13   : > { %s4645_s20 = scalar_lea.hbm %s6394_s0, %s4077_s16  ;;  %s241_s21 = scalar_lea.vmem [#allocation2], %s4020_s17 }
  0x14   : > { %s248_s22 = sshll.u32 %s241_s21, 4  ;;  %p4649_p13 = pnand %p4091_p10, %p4621_p5  ;;  %s4653_s22 = int_to_ptr.vmem [resolvable:$true] %s248_s22 }
  0x15   : > { %s4655_s29 = scalar_lea.sflag [#allocation3], %s237_s15  ;;  %s4419_s8 = scalar_lea.hbm %s4645_s20, 512 }
  0x16   : > { %p4420_p0 = scmp.ne.s32.totalorder %s4645_s20, %s4419_s8  ;;  %p4421_p1 = pneg %p4649_p13 }
  0x17   : > { %s4424_s17 = scalar_lea.hbm %s6394_s0, 1024  ;;  %p4425_p4 = scmp.lt.s32.totalorder %s4645_s20, %s6394_s0 }
  0x18   : > { %p4422_p2 = pnand %p4421_p1, %p4420_p0  ;;  %p4426_p5 = scmp.lt.s32.totalorder %s4424_s17, %s4419_s8 }
  0x1a   : > { %p4423_p3 = pneg %p4422_p2  ;;  %p4427_p7 = por %p4426_p5, %p4425_p4 }
  0x1c   : > { %p4428_p8 = pnand %p4427_p7, %p4423_p3 }
  0x1e   : > { %4431 = shalt.err (!%p4428_p8)
}
  0x1f   : > { %s4432_s15 = scalar_lea.vmem %s4653_s22, 512  ;;  %s4513_s19 = smov [#allocation2]  }
  0x20   : > { %p4433_p10 = scmp.ne.s32.totalorder %s4653_s22, %s4432_s15  ;;  %s4437_s21 = sshll.u32 %s4513_s19, 4  ;;  %s4438_s21 = int_to_ptr.vmem [resolvable:$false] %s4437_s21 }
  0x21   : > { %s4439_s9 = scalar_lea.vmem %s4438_s21, 1024  ;;  %p4440_p2 = scmp.lt.s32.totalorder %s4653_s22, %s4438_s21 }
  0x22   : > { %p4435_p9 = pnand %p4433_p10, %p4421_p1  ;;  %p4441_p12 = scmp.lt.s32.totalorder %s4439_s9, %s4432_s15 }
  0x24   : > { %p4436_p0 = pneg %p4435_p9  ;;  %p4442_p11 = por %p4441_p12, %p4440_p2 }
  0x26   : > { %p4443_p6 = pnand %p4442_p11, %p4436_p0 }
  0x28   : > { %4446 = shalt.err (!%p4443_p6)
}
  0x29   : > { %s4514_s8 = smov 256   ;;  %s4515_s16 = smov 16  }
  0x2a   : > { %4086 = dma.hbm_to_vmem [thread:$0]  (!%p4649_p13), %s4645_s20, 512, %s4653_s22, %s4655_s29, %s4514_s8, %s4514_s8, %s4515_s16  }
  0x2b   : > { %p4023_p9 = scmp.ge.s32.totalorder %s4511_s27, 1  ;;  %p256_p1 = scmp.lt.s32.totalorder %s4511_s27, 3 }
  0x2d   : > { %p257_p3 = pnand %p4023_p9, %p256_p1 }
  0x2f   : > { %260 = sbr.rel (%p257_p3) target bundleno = 1220 (0x4c4), region = 48 }
  0x34   : > { %s4679_s17 = sand.u32 1, %s4503_s25   ;;  %p6453_p6 = scmp.ne.s32.totalorder %s6449_s12, 0 }
  0x35   : > { %s6404_s11 = sshll.u32 %s4679_s17, 5  ;;  %s263_s18 = scalar_lea.sflag [#allocation3], %s4679_s17 }
  0x36   : > { %s4685_s15 = scalar_lea.vmem [#allocation2], %s6404_s11 }
  0x37   : > { %4490 = dma.done.wait (%p6453_p6), %s263_s18, 512  }
  0x38   : > { %4492 = vsyncadd (%p6453_p6), %s263_s18, 4294966784  ;;  %v4516_v0 = vmov 0   ;;  %v299_v1 = vld [vmem:[%s4685_s15 + $0x8] sm:$0xff]  ;;  %v301_v2 = vld [vmem:[%s4685_s15 + $0x18] sm:$0xff]  ;;  %vm311_vm0 = vcmask 130048   ;;  %s6415_s29 = smov 96   ;;  %v406_v20 = vlaneseq }
  0x39   : > { %347 = vmatprep.mubr.bf16.mxu0 %v4516_v0  ;;  %4152 = vset.pattern.permute.xlu0 %v4516_v0  ;;  %v298_v3 = vld [vmem:[%s4685_s15] sm:$0xff]  ;;  %v304_v4 = vpack.c.bf16 %v301_v2, %v299_v1  ;;  %v300_v5 = vld [vmem:[%s4685_s15 + $0x10] sm:$0xff]  ;;  %s4518_s19 = smov 112   ;;  %s6413_s21 = smov 80   ;;  %v4524_v18 = vmov 1983009808  }
  0x3a   : > { %2562 = vmatprep.mubr.bf16.mxu1 %v4516_v0  ;;  %4413 = vset.pattern.permute.xlu1 %v4516_v0  ;;  %v305_v6 = vld [vmem:[%s6396_s2] sm:$0xf]  ;;  %v303_v7 = vpack.c.bf16 %v300_v5, %v298_v3  ;;  %s6411_s9 = smov 64   ;;  %s6409_s8 = smov 48   ;;  %v404_v19 = vunpack.c.l.s4 %v4524_v18  ;;  %v407_v22 = vshrl.u32 %v406_v20, 7  ;;  %vm1183_vm1 = vcmask 1046528  }
  0x3b   : > { %308 = vperm.xlu0 %4152, %v305_v6   ;;  %329 = vmatprep.subr.bf16.mxu0 %v304_v4  ;;  %v302_v8 = vld [vmem:[%s6395_s1] sm:$0x3]  ;;  %s6407_s16 = smov 32   ;;  %s6405_s18 = smov 16   ;;  %v4525_v23 = vmov 1934713408  }
  0x3c   : > { %330 = vmatpush1.bf16.msra.mxu0 %v303_v7  ;;  %v405_v21 = vunpack.c.0.s8 %v404_v19  ;;  %v437_v24 = vunpack.c.l.s4 %v4525_v23  ;;  %s4526_s20 = smov 127   ;;  %s6421_s22 = smov 126   ;;  %vm1828_vm2 = vcmask 1045504   ;;  %vm735_vm3 = vcmask 97280  }
  0x3d   : > { %s6417_s12 = smov 12   ;;  %s4530_s23 = smov 28   ;;  %vm737_vm4 = vcmask 211968   ;;  %vm739_vm5 = vcmask 326656   ;;  %vm741_vm6 = vcmask 441344   ;;  %vm717_vm7 = vcmask 113664  }
  0x3e   : > { %v4715_v27 = vsub.s32 %v405_v21, %v407_v22  ;;  %v438_v29 = vunpack.c.0.s8 %v437_v24  ;;  %s4532_s11 = smov 56   ;;  %vm719_vm8 = vcmask 228352   ;;  %vm721_vm9 = vcmask 343040   ;;  %p6504_p12 = scmp.ne.s32.totalorder %s6450_s13, 0 }
  0x3f   : > { %4026 = vmatmul.mubr.msk.bf16.vlgmr.msra.gmra.mxu0 %vm311_vm0, %v302_v8  ;;  %vm723_vm10 = vcmask 457728   ;;  %vm725_vm11 = vcmask 572416   ;;  %vm727_vm12 = vcmask 687104   ;;  %vm729_vm13 = vcmask 801792  }
  0x40   : > { %2636 = vmatprep.mubr.bf16.mxu0 %v4516_v0  ;;  %6454 = vst [vmem:[#allocation8_spill] sm:$0xff] %v4715_v27  ;;  %v4718_v34 = vsub.s32 %v438_v29, %v407_v22  ;;  %vm731_vm14 = vcmask 916480   ;;  %vm733_vm15 = vcmask 1031168   ;;  %vm2523_vm0 = vcmask 1041408  }
  0x42   : > { %6455 = vst [vmem:[#allocation9_spill] sm:$0xff] %v4718_v34 }
  0xb6   : > { %v309_v9 = vpop.permute.xlu0 %308 }
  0xff   : > { %v349_v10 = vpop.f32.mrf.mxu0 }
 0x100   : > { %v350_v11 = vadd.f32 %v349_v10, %v309_v9 }
 0x101   : > { %v351_v12 = vpop.f32.mrf.mxu0 }
 0x102   : > { %v356_v13 = vmax.f32 %v350_v11, 0.0  ;;  %v352_v16 = vadd.f32 %v351_v12, %v309_v9 }
 0x103   : > { %v353_v14 = vpop.f32.mrf.mxu0 }
 0x104   : > { %362 = vrot.lane.b32.xlu1 %v356_v13, %s6415_s29  ;;  %359 = vrot.lane.b32.xlu0 %v356_v13, %s4518_s19  ;;  %v357_v17 = vmax.f32 %v352_v16, 0.0 }
 0x105   : > { %v354_v15 = vpop.f32.mrf.mxu0 }
 0x108   : > { %365 = vrot.lane.b32.xlu1 %v356_v13, %s6413_s21  ;;  %368 = vrot.lane.b32.xlu0 %v356_v13, %s6411_s9 }
 0x10c   : > { %371 = vrot.lane.b32.xlu1 %v356_v13, %s6409_s8  ;;  %374 = vrot.lane.b32.xlu0 %v356_v13, %s6407_s16 }
 0x110   : > { %377 = vrot.lane.b32.xlu1 %v356_v13, %s6405_s18  ;;  %381 = vrot.lane.b32.xlu0 %v357_v17, %s4518_s19 }
 0x114   : > { %384 = vrot.lane.b32.xlu1 %v357_v17, %s6415_s29  ;;  %387 = vrot.lane.b32.xlu0 %v357_v17, %s6413_s21  ;;  %s4537_s21 = smov 42   ;;  %s6425_s29 = smov 70  }
 0x118   : > { %390 = vrot.lane.b32.xlu1 %v357_v17, %s6411_s9  ;;  %393 = vrot.lane.b32.xlu0 %v357_v17, %s6409_s8  ;;  %s6427_s8 = smov 98   ;;  %s4536_s9 = smov 14  }
 0x11c   : > { %396 = vrot.lane.b32.xlu1 %v357_v17, %s6407_s16  ;;  %399 = vrot.lane.b32.xlu0 %v357_v17, %s6405_s18  ;;  %s6419_s18 = smov 26   ;;  %s6423_s16 = smov 84  }
 0x176   : > { %v363_v25 = vpop.permute.xlu1 %362  ;;  %v360_v26 = vpop.permute.xlu0 %359 }
 0x177   : > { %v402_v28 = vcombine.low %v356_v13, %v363_v25 }
 0x179   : > { %v409_v33 = vrot.slane %v402_v28, %v4715_v27 }
 0x17a   : > { %v366_v30 = vpop.permute.xlu1 %365  ;;  %v369_v31 = vpop.permute.xlu0 %368 }
 0x17b   : > { %v410_v32 = vcombine.low %v360_v26, %v366_v30 }
 0x17d   : > { %v417_v35 = vrot.slane %v410_v32, %v4715_v27 }
 0x17e   : > { %v372_v36 = vpop.permute.xlu1 %371  ;;  %v375_v37 = vpop.permute.xlu0 %374 }
 0x17f   : > { %v434_v38 = vcombine.low %v409_v33, %v417_v35  ;;  %v435_v39 = vcombine.high %v409_v33, %v417_v35  ;;  %v418_v42 = vcombine.low %v369_v31, %v375_v37 }
 0x181   : > { %v442_v40 = vrot.slane %v434_v38, %v4718_v34  ;;  %v449_v41 = vrot.slane %v435_v39, %v4718_v34  ;;  %v425_v48 = vrot.slane %v418_v42, %v4715_v27 }
 0x182   : > { %v378_v43 = vpop.permute.xlu1 %377  ;;  %v382_v44 = vpop.permute.xlu0 %381 }
 0x183   : > { %v426_v45 = vcombine.low %v372_v36, %v378_v43  ;;  %v4027_v46 = vcombine.low %v442_v40, %v449_v41  ;;  %v4029_v47 = vcombine.high %v442_v40, %v449_v41 }
 0x185   : > { %v433_v49 = vrot.slane %v426_v45, %v4715_v27  ;;  %v4726_v50 = vrot.slane %v4027_v46, %v4715_v27  ;;  %v4729_v51 = vrot.slane %v4029_v47, %v4715_v27 }
 0x186   : > { %v385_v52 = vpop.permute.xlu1 %384  ;;  %v388_v53 = vpop.permute.xlu0 %387 }
 0x187   : > { %v450_v54 = vcombine.low %v425_v48, %v433_v49  ;;  %v451_v55 = vcombine.high %v425_v48, %v433_v49  ;;  %v470_v56 = vcombine.low %v357_v17, %v385_v52  ;;  %v478_v57 = vcombine.low %v382_v44, %v388_v53 }
 0x188   : > { %v571_v58 = vcombine.high %v4726_v50, %v4729_v51  ;;  %v570_v59 = vcombine.low %v4726_v50, %v4729_v51 }
 0x189   : > { %v458_v60 = vrot.slane %v450_v54, %v4718_v34  ;;  %v465_v61 = vrot.slane %v451_v55, %v4718_v34  ;;  %v477_v62 = vrot.slane %v470_v56, %v4715_v27  ;;  %v485_v63 = vrot.slane %v478_v57, %v4715_v27 }
 0x18a   : > { %v391_v0 = vpop.permute.xlu1 %390  ;;  %v394_v1 = vpop.permute.xlu0 %393 }
 0x18b   : > { %v502_v2 = vcombine.low %v477_v62, %v485_v63  ;;  %v503_v3 = vcombine.high %v477_v62, %v485_v63  ;;  %v4739_v4 = vcombine.high %v442_v40, %v458_v60  ;;  %v4741_v5 = vcombine.low %v442_v40, %v458_v60 }
 0x18c   : > { %v4028_v6 = vcombine.low %v458_v60, %v465_v61  ;;  %v4030_v7 = vcombine.high %v458_v60, %v465_v61  ;;  %v4749_v14 = vcombine.high %v449_v41, %v465_v61  ;;  %v4751_v15 = vcombine.low %v449_v41, %v465_v61 }
 0x18d   : > { %v510_v8 = vrot.slane %v502_v2, %v4718_v34  ;;  %v517_v9 = vrot.slane %v503_v3, %v4718_v34  ;;  %755 = vrot.lane.b32.xlu0 %v4739_v4, %s4526_s20  ;;  %751 = vrot.lane.b32.xlu1 %v4741_v5, %s4526_s20  ;;  %v1187_v44 = vrot.slane %v4739_v4, 1  ;;  %v1184_v45 = vrot.slane %v4741_v5, 1 }
 0x18e   : > { %v397_v10 = vpop.permute.xlu1 %396  ;;  %v400_v11 = vpop.permute.xlu0 %399  ;;  %v4754_v18 = vrot.slane %v4028_v6, %v4715_v27  ;;  %v569_v19 = vrot.slane %v4030_v7, %v4715_v27  ;;  %v1193_v46 = vrot.slane %v4749_v14, 1  ;;  %v1190_v52 = vrot.slane %v4751_v15, 1 }
 0x18f   : > { %v486_v12 = vcombine.low %v391_v0, %v397_v10  ;;  %v494_v13 = vcombine.low %v394_v1, %v400_v11  ;;  %v4031_v16 = vcombine.low %v510_v8, %v517_v9  ;;  %v4033_v17 = vcombine.high %v510_v8, %v517_v9 }
 0x190   : > { %v586_v24 = vcombine.low %v4754_v18, %v569_v19  ;;  %v587_v25 = vcombine.high %v4754_v18, %v569_v19  ;;  %v4851_v6 = vrot.slane %v571_v58, %v4718_v34 }
 0x191   : > { %v493_v20 = vrot.slane %v486_v12, %v4715_v27  ;;  %v501_v21 = vrot.slane %v494_v13, %v4715_v27  ;;  %763 = vrot.lane.b32.xlu0 %v4749_v14, %s4526_s20  ;;  %759 = vrot.lane.b32.xlu1 %v4751_v15, %s4526_s20  ;;  %v4764_v22 = vrot.slane %v4031_v16, %v4715_v27 }
 0x192   : > { %v4767_v23 = vrot.slane %v4033_v17, %v4715_v27  ;;  %v4860_v11 = vrot.slane %v586_v24, %v4718_v34  ;;  %v4863_v12 = vrot.slane %v587_v25, %v4718_v34 }
 0x193   : > { %v518_v26 = vcombine.low %v493_v20, %v501_v21  ;;  %v519_v28 = vcombine.high %v493_v20, %v501_v21 }
 0x194   : > { %v639_v29 = vcombine.high %v4764_v22, %v4767_v23  ;;  %v638_v30 = vcombine.low %v4764_v22, %v4767_v23 }
 0x195   : > { %v526_v31 = vrot.slane %v518_v26, %v4718_v34  ;;  %v533_v32 = vrot.slane %v519_v28, %v4718_v34  ;;  %971 = vrot.lane.b32.xlu0 %v4739_v4, %s6421_s22  ;;  %967 = vrot.lane.b32.xlu1 %v4741_v5, %s6421_s22  ;;  %v4528_v28 = vmov 0.0  }
 0x197   : > { %v535_v33 = vcombine.high %v510_v8, %v526_v31  ;;  %v4781_v35 = vcombine.low %v510_v8, %v526_v31  ;;  %v4783_v36 = vcombine.high %v517_v9, %v533_v32  ;;  %v4785_v37 = vcombine.low %v517_v9, %v533_v32 }
 0x198   : > { %v4032_v38 = vcombine.low %v526_v31, %v533_v32  ;;  %v4034_v39 = vcombine.high %v526_v31, %v533_v32  ;;  %v4888_v31 = vcombine.high %v4851_v6, %v4528_v28 }
 0x199   : > { %979 = vrot.lane.b32.xlu0 %v4749_v14, %s6421_s22  ;;  %975 = vrot.lane.b32.xlu1 %v4751_v15, %s6421_s22  ;;  %v4791_v40 = vrot.slane %v535_v33, 1  ;;  %v4794_v41 = vrot.slane %v4781_v35, 1  ;;  %v4797_v42 = vrot.slane %v4783_v36, 1  ;;  %v4800_v43 = vrot.slane %v4785_v37, 1 }
 0x19a   : > { %v621_v60 = vrot.slane %v4032_v38, %v4715_v27  ;;  %v637_v3 = vrot.slane %v4034_v39, %v4715_v27  ;;  %v1833_v32 = vrot.slane %v535_v33, 2  ;;  %v4898_v39 = vcombine.high %v4863_v12, %v4528_v28 }
 0x19b   : > { %v4809_v47 = vsel %vm1183_vm1, %v1187_v44, %v4791_v40  ;;  %v4812_v48 = vsel %vm1183_vm1, %v1184_v45, %v4794_v41  ;;  %v4815_v49 = vsel %vm1183_vm1, %v1193_v46, %v4797_v42  ;;  %v4823_v55 = vsel %vm1183_vm1, %v1190_v52, %v4800_v43 }
 0x19c   : > { %v1220_v53 = vcombine.low %v4809_v47, %v4815_v49  ;;  %v1221_v54 = vcombine.high %v4809_v47, %v4815_v49  ;;  %v1204_v56 = vcombine.low %v4812_v48, %v4823_v55  ;;  %v1205_v57 = vcombine.high %v4812_v48, %v4823_v55 }
 0x19d   : > { %757 = vrot.lane.b32.xlu0 %v535_v33, %s4526_s20  ;;  %753 = vrot.lane.b32.xlu1 %v4781_v35, %s4526_s20  ;;  %v1272_v63 = vcombine.low %v4794_v41, %v4800_v43  ;;  %v1288_v2 = vcombine.low %v4791_v40, %v4797_v42  ;;  %v1273_v7 = vcombine.high %v4794_v41, %v4800_v43  ;;  %vm2497_vm1 = vcmask 1043456  }
 0x19e   : > { %v4835_v61 = vrot.slane %v1220_v53, %v4715_v27  ;;  %v1235_v62 = vrot.slane %v1221_v54, %v4715_v27  ;;  %v4841_v0 = vrot.slane %v1204_v56, %v4715_v27  ;;  %v1219_v1 = vrot.slane %v1205_v57, %v4715_v27 }
 0x19f   : > { %v1289_v8 = vcombine.high %v4791_v40, %v4797_v42  ;;  %v654_v10 = vcombine.low %v621_v60, %v637_v3  ;;  %v1287_v58 = vrot.slane %v1273_v7, %v4715_v27  ;;  %v4871_v17 = vrot.slane %v1272_v63, %v4715_v27 }
 0x1a0   : > { %v1237_v9 = vcombine.high %v4841_v0, %v4835_v61  ;;  %v1252_v16 = vcombine.low %v1219_v1, %v1235_v62  ;;  %v4874_v18 = vrot.slane %v1288_v2, %v4715_v27  ;;  %v1253_v24 = vcombine.high %v1219_v1, %v1235_v62 }
 0x1a1   : > { %765 = vrot.lane.b32.xlu0 %v4783_v36, %s4526_s20  ;;  %761 = vrot.lane.b32.xlu1 %v4785_v37, %s4526_s20  ;;  %v1303_v13 = vrot.slane %v1289_v8, %v4715_v27  ;;  %v1236_v25 = vcombine.low %v4841_v0, %v4835_v61  ;;  %v4902_v44 = vcombine.high %v4860_v11, %v4528_v28  ;;  %v1830_v53 = vrot.slane %v4781_v35, 2 }
 0x1a2   : > { %v4877_v19 = vrot.slane %v1237_v9, %v4718_v34  ;;  %v4880_v21 = vrot.slane %v1252_v16, %v4718_v34  ;;  %v1304_v46 = vcombine.low %v4871_v17, %v4874_v18  ;;  %v4910_v52 = vrot.slane %v1253_v24, %v4718_v34 }
 0x1a3   : > { %v1320_v20 = vcombine.low %v1287_v58, %v1303_v13  ;;  %v1839_v54 = vrot.slane %v4783_v36, 2  ;;  %v1836_v56 = vrot.slane %v4785_v37, 2  ;;  %v4924_v60 = vrot.slane %v654_v10, %v4718_v34 }
 0x1a4   : > { %v4163_v26 = vpack.i.bf16 %v4851_v6, %v4877_v19  ;;  %v4168_v38 = vpack.i.bf16 %v4860_v11, %v4880_v21  ;;  %v4921_v57 = vcombine.high %v4880_v21, %v4528_v28  ;;  %v4173_v62 = vpack.i.bf16 %v4863_v12, %v4910_v52 }
 0x1a5   : > { %973 = vrot.lane.b32.xlu0 %v535_v33, %s6421_s22  ;;  %969 = vrot.lane.b32.xlu1 %v4781_v35, %s6421_s22  ;;  %v4905_v45 = vrot.slane %v1320_v20, %v4718_v34  ;;  %v4914_v33 = vcombine.high %v4877_v19, %v4528_v28  ;;  %v4930_v63 = vcombine.high %v4910_v52, %v4528_v28 }
 0x1a6   : > { %v4943_v1 = vrot.slane %v1304_v46, %v4718_v34  ;;  %v1918_v3 = vcombine.high %v1830_v53, %v1836_v56  ;;  %v1934_v7 = vcombine.high %v1833_v32, %v1839_v54  ;;  %v1917_v8 = vcombine.low %v1830_v53, %v1836_v56 }
 0x1a7   : > { %v4193_v35 = vpack.i.bf16 %v4888_v31, %v4914_v33  ;;  %v4203_v2 = vpack.i.bf16 %v4898_v39, %v4930_v63  ;;  %v1933_v9 = vcombine.low %v1833_v32, %v1839_v54  ;;  %v4949_v10 = vcombine.high %v4924_v60, %v4528_v28 }
 0x1a8   : > { %v4955_v58 = vrot.slane %v638_v30, %v4718_v34  ;;  %v4960_v13 = vrot.slane %v1918_v3, %v4715_v27  ;;  %v4963_v16 = vrot.slane %v1934_v7, %v4715_v27  ;;  %v4966_v20 = vrot.slane %v1917_v8, %v4715_v27 }
 0x1a9   : > { %981 = vrot.lane.b32.xlu0 %v4783_v36, %s6421_s22  ;;  %977 = vrot.lane.b32.xlu1 %v4785_v37, %s6421_s22  ;;  %v4940_v37 = vcombine.high %v4905_v45, %v4528_v28  ;;  %v4969_v24 = vrot.slane %v1933_v9, %v4715_v27  ;;  %v1832_v8 = vrot.slane %v4739_v4, 2  ;;  %v1829_v9 = vrot.slane %v4741_v5, 2 }
 0x1aa   : > { %v1965_v46 = vcombine.low %v4960_v13, %v4963_v16  ;;  %v1305_v4 = vcombine.high %v4871_v17, %v4874_v18  ;;  %v4158_v22 = vpack.i.bf16 %v4924_v60, %v4905_v45  ;;  %v5063_v6 = vrot.slane %v1236_v25, %v4718_v34 }
 0x1ab   : > { %v1949_v3 = vcombine.low %v4966_v20, %v4969_v24  ;;  %v1950_v7 = vcombine.high %v4966_v20, %v4969_v24  ;;  %v5003_v36 = vsel %vm1828_vm2, %v1832_v8, %v1833_v32  ;;  %v5005_v30 = vsel %vm1828_vm2, %v1829_v9, %v1830_v53 }
 0x1ac   : > { %v1319_v5 = vrot.slane %v1305_v4, %v4718_v34  ;;  %v5074_v17 = vrot.slane %v570_v59, %v4718_v34  ;;  %v1268_v61 = vcombine.high %v5063_v6, %v4528_v28  ;;  %v6456_v31 = vpack.i.bf16 %v4902_v44, %v4921_v57 }
 0x1ad   : > { %2263 = vrot.lane.b32.xlu0 %v1833_v32, %s6421_s22  ;;  %2259 = vrot.lane.b32.xlu1 %v1830_v53, %s6421_s22 }
 0x1ae   : > { %v602_v50 = vcombine.high %v5074_v17, %v4528_v28 }
 0x1b0   : > { %v4188_v51 = vpack.i.bf16 %v602_v50, %v1268_v61 }
 0x1b1   : > { %2271 = vrot.lane.b32.xlu0 %v1839_v54, %s6421_s22  ;;  %2267 = vrot.lane.b32.xlu1 %v1836_v56, %s6421_s22 }
 0x1b5   : > { %1618 = vrot.lane.b32.xlu0 %v4791_v40, %s6421_s22  ;;  %1614 = vrot.lane.b32.xlu1 %v4794_v41, %s6421_s22 }
 0x1b9   : > { %1626 = vrot.lane.b32.xlu0 %v4797_v42, %s6421_s22  ;;  %1622 = vrot.lane.b32.xlu1 %v4800_v43, %s6421_s22 }
 0x1bd   : > { %2047 = vrot.lane.b32.xlu0 %v1833_v32, %s4526_s20  ;;  %2043 = vrot.lane.b32.xlu1 %v1830_v53, %s4526_s20 }
 0x1c1   : > { %2055 = vrot.lane.b32.xlu0 %v1839_v54, %s4526_s20  ;;  %2051 = vrot.lane.b32.xlu1 %v1836_v56, %s4526_s20 }
 0x1c5   : > { %1402 = vrot.lane.b32.xlu0 %v4791_v40, %s4526_s20  ;;  %1398 = vrot.lane.b32.xlu1 %v4794_v41, %s4526_s20  ;;  %v1838_v40 = vrot.slane %v4749_v14, 2  ;;  %v1835_v41 = vrot.slane %v4751_v15, 2  ;;  %v653_v14 = vrot.slane %v639_v29, %v4718_v34  ;;  %v1329_v29 = vcombine.high %v1319_v5, %v4528_v28 }
 0x1c7   : > { %v4153_v15 = vpack.i.bf16 %v653_v14, %v1319_v5 }
 0x1c9   : > { %1410 = vrot.lane.b32.xlu0 %v4797_v42, %s4526_s20  ;;  %1406 = vrot.lane.b32.xlu1 %v4800_v43, %s4526_s20  ;;  %v1840_v42 = vsel %vm1828_vm2, %v1838_v40, %v1839_v54  ;;  %v1837_v43 = vsel %vm1828_vm2, %v1835_v41, %v1836_v56  ;;  %vm2519_vm2 = vcmask 293888  }
 0x1ca   : > { %v1865_v59 = vcombine.low %v5003_v36, %v1840_v42  ;;  %v1866_v0 = vcombine.high %v5003_v36, %v1840_v42  ;;  %v1849_v11 = vcombine.low %v5005_v30, %v1837_v43  ;;  %v1850_v12 = vcombine.high %v5005_v30, %v1837_v43 }
 0x1cc   : > { %v1873_v21 = vrot.slane %v1865_v59, %v4715_v27  ;;  %v1880_v25 = vrot.slane %v1866_v0, %v4715_v27  ;;  %v1864_v32 = vrot.slane %v1850_v12, %v4715_v27 }
 0x1cd   : > { %2261 = vrot.lane.b32.xlu0 %v5003_v36, %s6421_s22  ;;  %2257 = vrot.lane.b32.xlu1 %v5005_v30, %s6421_s22 }
 0x1d1   : > { %2269 = vrot.lane.b32.xlu0 %v1840_v42, %s6421_s22  ;;  %2265 = vrot.lane.b32.xlu1 %v1837_v43, %s6421_s22 }
 0x1d5   : > { %1616 = vrot.lane.b32.xlu0 %v4809_v47, %s6421_s22  ;;  %1612 = vrot.lane.b32.xlu1 %v4812_v48, %s6421_s22 }
 0x1d9   : > { %1624 = vrot.lane.b32.xlu0 %v4815_v49, %s6421_s22  ;;  %1620 = vrot.lane.b32.xlu1 %v4823_v55, %s6421_s22 }
 0x1dd   : > { %2045 = vrot.lane.b32.xlu0 %v5003_v36, %s4526_s20  ;;  %2041 = vrot.lane.b32.xlu1 %v5005_v30, %s4526_s20  ;;  %v1897_v36 = vcombine.low %v1864_v32, %v1880_v25 }
 0x1df   : > { %v5117_v4 = vrot.slane %v1897_v36, %v4718_v34 }
 0x1e1   : > { %2053 = vrot.lane.b32.xlu0 %v1840_v42, %s4526_s20  ;;  %2049 = vrot.lane.b32.xlu1 %v1837_v43, %s4526_s20 }
 0x1e5   : > { %1400 = vrot.lane.b32.xlu0 %v4809_v47, %s4526_s20  ;;  %1396 = vrot.lane.b32.xlu1 %v4812_v48, %s4526_s20  ;;  %v1328_v47 = vcombine.high %v4943_v1, %v4528_v28  ;;  %v662_v48 = vcombine.high %v4955_v58, %v4528_v28 }
 0x1e7   : > { %v4178_v23 = vpack.i.bf16 %v662_v48, %v1328_v47 }
 0x1e9   : > { %1408 = vrot.lane.b32.xlu0 %v4815_v49, %s4526_s20  ;;  %1404 = vrot.lane.b32.xlu1 %v4823_v55, %s4526_s20  ;;  %s6429_s20 = smov 40   ;;  %v663_v49 = vcombine.high %v653_v14, %v4528_v28 }
 0x1eb   : > { %v4183_v55 = vpack.i.bf16 %v663_v49, %v1329_v29 }
 0x1ed   : > { %4154 = vrot.lane.b32.xlu1 %v4153_v15, %s6417_s12  ;;  %4164 = vrot.lane.b32.xlu0 %v4163_v26, %s4530_s23  ;;  %v1857_v26 = vrot.slane %v1849_v11, %v4715_v27  ;;  %v1898_v11 = vcombine.high %v1864_v32, %v1880_v25 }
 0x1ef   : > { %v1881_v30 = vcombine.low %v1857_v26, %v1873_v21 }
 0x1f1   : > { %4159 = vrot.lane.b32.xlu1 %v4158_v22, %s6429_s20  ;;  %4179 = vrot.lane.b32.xlu0 %v4178_v23, %s6421_s22  ;;  %v5123_v14 = vrot.slane %v1881_v30, %v4718_v34 }
 0x1f3   : > { %v1913_v0 = vcombine.high %v5123_v14, %v4528_v28 }
 0x1f5   : > { %4169 = vrot.lane.b32.xlu1 %v4168_v38, %s4532_s11  ;;  %4184 = vrot.lane.b32.xlu0 %v4183_v55, %s6419_s18 }
 0x1f9   : > { %4174 = vrot.lane.b32.xlu1 %v4173_v62, %s6423_s16  ;;  %4204 = vrot.lane.b32.xlu0 %v4203_v2, %s6427_s8  ;;  %v1882_v2 = vcombine.high %v1857_v26, %v1873_v21 }
 0x1fb   : > { %v5120_v5 = vrot.slane %v1882_v2, %v4718_v34 }
 0x1fd   : > { %4189 = vrot.lane.b32.xlu1 %v4188_v51, %s4536_s9 }
 0x1ff   : > { %v752_v18 = vpop.permute.xlu1 %751  ;;  %v756_v19 = vpop.permute.xlu0 %755 }
 0x201   : > { %4194 = vrot.lane.b32.xlu1 %v4193_v35, %s4537_s21 }
 0x203   : > { %v760_v38 = vpop.permute.xlu1 %759  ;;  %v764_v39 = vpop.permute.xlu0 %763 }
 0x204   : > { %v775_v45 = vcombine.low %v752_v18, %v760_v38  ;;  %v776_v52 = vcombine.high %v752_v18, %v760_v38  ;;  %v791_v53 = vcombine.low %v756_v19, %v764_v39  ;;  %v792_v54 = vcombine.high %v756_v19, %v764_v39 }
 0x205   : > { %4199 = vrot.lane.b32.xlu1 %v6456_v31, %s6425_s29 }
 0x206   : > { %v783_v33 = vrot.slane %v775_v45, %v4715_v27  ;;  %v790_v56 = vrot.slane %v776_v52, %v4715_v27  ;;  %v799_v60 = vrot.slane %v791_v53, %v4715_v27  ;;  %v806_v62 = vrot.slane %v792_v54, %v4715_v27 }
 0x207   : > { %v968_v63 = vpop.permute.xlu1 %967  ;;  %v972_v35 = vpop.permute.xlu0 %971  ;;  %v5146_v52 = vrot.slane %v1898_v11, %v4718_v34 }
 0x208   : > { %v807_v8 = vcombine.low %v783_v33, %v799_v60  ;;  %v808_v9 = vcombine.high %v783_v33, %v799_v60  ;;  %v823_v40 = vcombine.low %v790_v56, %v806_v62  ;;  %v824_v15 = vcombine.high %v790_v56, %v806_v62 }
 0x20a   : > { %v5110_v41 = vrot.slane %v823_v40, %v4718_v34  ;;  %v822_v44 = vrot.slane %v808_v9, %v4718_v34  ;;  %v5114_v57 = vrot.slane %v807_v8, %v4718_v34  ;;  %v5139_v26 = vrot.slane %v824_v15, %v4718_v34 }
 0x20b   : > { %v976_v42 = vpop.permute.xlu1 %975  ;;  %v980_v43 = vpop.permute.xlu0 %979  ;;  %v5173_v15 = vrot.slane %v1965_v46, %v4718_v34 }
 0x20c   : > { %v991_v47 = vcombine.low %v968_v63, %v976_v42  ;;  %v992_v48 = vcombine.high %v968_v63, %v976_v42  ;;  %v1007_v22 = vcombine.low %v972_v35, %v980_v43  ;;  %v1008_v23 = vcombine.high %v972_v35, %v980_v43 }
 0x20d   : > { %v4213_v29 = vpack.i.bf16 %v5110_v41, %v5117_v4  ;;  %v4208_v49 = vpack.i.bf16 %v822_v44, %v5120_v5  ;;  %v839_v55 = vcombine.high %v5114_v57, %v4528_v28  ;;  %v4218_v31 = vpack.i.bf16 %v5139_v26, %v5146_v52 }
 0x20e   : > { %v999_v61 = vrot.slane %v991_v47, %v4715_v27  ;;  %v1015_v50 = vrot.slane %v1007_v22, %v4715_v27  ;;  %v1006_v18 = vrot.slane %v992_v48, %v4715_v27  ;;  %v1022_v19 = vrot.slane %v1008_v23, %v4715_v27 }
 0x20f   : > { %4214 = vrot.lane.b32.xlu1 %v4213_v29, %s4532_s11  ;;  %4209 = vrot.lane.b32.xlu0 %v4208_v49, %s4530_s23  ;;  %v754_v51 = vpop.permute.xlu1 %753  ;;  %v758_v59 = vpop.permute.xlu0 %757  ;;  %v4223_v21 = vpack.i.bf16 %v839_v55, %v1913_v0  ;;  %v840_v13 = vcombine.high %v822_v44, %v4528_v28  ;;  %v5198_v55 = vrot.slane %v1949_v3, %v4718_v34 }
 0x210   : > { %v1024_v12 = vcombine.high %v999_v61, %v1015_v50  ;;  %v1039_v33 = vcombine.low %v1006_v18, %v1022_v19  ;;  %v1040_v40 = vcombine.high %v1006_v18, %v1022_v19  ;;  %v1023_v29 = vcombine.low %v999_v61, %v1015_v50 }
 0x211   : > { %v1914_v61 = vcombine.high %v5120_v5, %v4528_v28 }
 0x212   : > { %v5142_v38 = vrot.slane %v1024_v12, %v4718_v34  ;;  %v1047_v8 = vrot.slane %v1039_v33, %v4718_v34  ;;  %v5186_v49 = vrot.slane %v1040_v40, %v4718_v34  ;;  %v5213_v0 = vrot.slane %v1023_v29, %v4718_v34 }
 0x213   : > { %4224 = vrot.lane.b32.xlu1 %v4223_v21, %s4536_s9  ;;  %v762_v39 = vpop.permute.xlu1 %761  ;;  %v766_v45 = vpop.permute.xlu0 %765  ;;  %v841_v21 = vcombine.high %v5110_v41, %v4528_v28  ;;  %v5246_v33 = vrot.slane %v1950_v7, %v4718_v34 }
 0x214   : > { %v843_v25 = vcombine.low %v754_v51, %v762_v39  ;;  %v844_v32 = vcombine.high %v754_v51, %v762_v39  ;;  %v859_v53 = vcombine.low %v758_v59, %v766_v45  ;;  %v860_v54 = vcombine.high %v758_v59, %v766_v45  ;;  %1123 = vrot.lane.b32.xlu0 %v5142_v38, %s4530_s23 }
 0x215   : > { %v4228_v59 = vpack.i.bf16 %v840_v13, %v1914_v61  ;;  %v1057_v5 = vcombine.high %v1047_v8, %v4528_v28  ;;  %v1055_v19 = vcombine.high %v5213_v0, %v4528_v28  ;;  %v1916_v61 = vcombine.high %v5146_v52, %v4528_v28 }
 0x216   : > { %v851_v56 = vrot.slane %v843_v25, %v4715_v27  ;;  %v858_v60 = vrot.slane %v844_v32, %v4715_v27  ;;  %v867_v62 = vrot.slane %v859_v53, %v4715_v27  ;;  %v874_v63 = vrot.slane %v860_v54, %v4715_v27 }
 0x217   : > { %v5156_v35 = vpop.permute.xlu1 %969  ;;  %v5158_v36 = vpop.permute.xlu0 %973  ;;  %v1915_v25 = vcombine.high %v5117_v4, %v4528_v28 }
 0x218   : > { %v891_v2 = vcombine.low %v858_v60, %v874_v63  ;;  %4219 = vrot.lane.b32.xlu0 %v4218_v31, %s6423_s16  ;;  %v875_v30 = vcombine.low %v851_v56, %v867_v62  ;;  %v876_v18 = vcombine.high %v851_v56, %v867_v62 }
 0x219   : > { %v4233_v53 = vpack.i.bf16 %v841_v21, %v1915_v25 }
 0x21a   : > { %v5163_v9 = vrot.slane %v891_v2, %v4718_v34  ;;  %v5183_v23 = vrot.slane %v875_v30, %v4718_v34  ;;  %v5238_v54 = vrot.slane %v876_v18, %v4718_v34 }
 0x21b   : > { %v5165_v42 = vpop.permute.xlu1 %977  ;;  %v5167_v43 = vpop.permute.xlu0 %981 }
 0x21c   : > { %1131 = vrot.lane.b32.xlu0 %v1047_v8, %s4532_s11  ;;  %v1059_v47 = vcombine.low %v5156_v35, %v5165_v42  ;;  %v1075_v48 = vcombine.low %v5158_v36, %v5167_v43  ;;  %v4248_v22 = vpack.i.bf16 %v5163_v9, %v5173_v15  ;;  %v4253_v51 = vpack.i.bf16 %v5183_v23, %v5198_v55 }
 0x21d   : > { %v4238_v20 = vpack.i.bf16 %v5238_v54, %v5246_v33 }
 0x21e   : > { %4249 = vrot.lane.b32.xlu1 %v4248_v22, %s6429_s20  ;;  %v5205_v44 = vrot.slane %v1059_v47, %v4715_v27  ;;  %v5208_v50 = vrot.slane %v1075_v48, %v4715_v27  ;;  %v1056_v47 = vcombine.high %v5142_v38, %v4528_v28  ;;  %v842_v48 = vcombine.high %v5139_v26, %v4528_v28 }
 0x21f   : > { %v5190_v16 = vpop.permute.xlu1 %2259  ;;  %v5192_v46 = vpop.permute.xlu0 %2263 }
 0x220   : > { %1139 = vrot.lane.b32.xlu0 %v5186_v49, %s6423_s16  ;;  %v1092_v12 = vcombine.high %v5205_v44, %v5208_v50 }
 0x222   : > { %4254 = vrot.lane.b32.xlu1 %v4253_v51, %s4518_s19  ;;  %v5235_v32 = vrot.slane %v1092_v12, %v4718_v34  ;;  %v4243_v12 = vpack.i.bf16 %v842_v48, %v1916_v61 }
 0x223   : > { %v2268_v3 = vpop.permute.xlu1 %2267  ;;  %v5216_v11 = vpop.permute.xlu0 %2271 }
 0x224   : > { %4229 = vrot.lane.b32.xlu0 %v4228_v59, %s4537_s21  ;;  %v2349_v4 = vcombine.low %v5190_v16, %v2268_v3  ;;  %v2365_v56 = vcombine.low %v5192_v46, %v5216_v11  ;;  %v2350_v59 = vcombine.high %v5190_v16, %v2268_v3  ;;  %v2366_v52 = vcombine.high %v5192_v46, %v5216_v11 }
 0x226   : > { %1135 = vrot.lane.b32.xlu1 %v1057_v5, %s6425_s29  ;;  %v2357_v30 = vrot.slane %v2349_v4, %v4715_v27  ;;  %v2373_v8 = vrot.slane %v2365_v56, %v4715_v27 }
 0x227   : > { %v5227_v39 = vpop.permute.xlu1 %1614  ;;  %v5229_v45 = vpop.permute.xlu0 %1618 }
 0x228   : > { %1119 = vrot.lane.b32.xlu0 %v1055_v19, %s4536_s9  ;;  %v2382_v13 = vcombine.high %v2357_v30, %v2373_v8  ;;  %v2381_v5 = vcombine.low %v2357_v30, %v2373_v8  ;;  %v2380_v30 = vrot.slane %v2366_v52, %v4715_v27 }
 0x22a   : > { %1155 = vrot.lane.b32.xlu1 %v5235_v32, %s6417_s12  ;;  %v5274_v4 = vrot.slane %v2382_v13, %v4718_v34 }
 0x22b   : > { %v1623_v41 = vpop.permute.xlu1 %1622  ;;  %v1627_v31 = vpop.permute.xlu0 %1626 }
 0x22c   : > { %v1704_v60 = vcombine.low %v5227_v39, %v1623_v41  ;;  %v1720_v62 = vcombine.low %v5229_v45, %v1627_v31  ;;  %4234 = vrot.lane.b32.xlu0 %v4233_v53, %s6425_s29  ;;  %v1705_v16 = vcombine.high %v5227_v39, %v1623_v41  ;;  %v1721_v3 = vcombine.high %v5229_v45, %v1627_v31 }
 0x22e   : > { %v1712_v63 = vrot.slane %v1704_v60, %v4715_v27  ;;  %v1728_v2 = vrot.slane %v1720_v62, %v4715_v27  ;;  %v2364_v60 = vrot.slane %v2350_v59, %v4715_v27  ;;  %v1719_v8 = vrot.slane %v1705_v16, %v4715_v27 }
 0x22f   : > { %v2044_v24 = vpop.permute.xlu1 %2043  ;;  %v2048_v7 = vpop.permute.xlu0 %2047 }
 0x230   : > { %4239 = vrot.lane.b32.xlu0 %v4238_v20, %s6417_s12  ;;  %v1737_v40 = vcombine.high %v1712_v63, %v1728_v2  ;;  %v1736_v51 = vcombine.low %v1712_v63, %v1728_v2  ;;  %v5287_v63 = vrot.slane %v2381_v5, %v4718_v34 }
 0x232   : > { %v5270_v18 = vrot.slane %v1737_v40, %v4718_v34  ;;  %v5281_v56 = vrot.slane %v1736_v51, %v4718_v34  ;;  %v1735_v40 = vrot.slane %v1721_v3, %v4715_v27 }
 0x233   : > { %v2052_v22 = vpop.permute.xlu1 %2051  ;;  %v2056_v29 = vpop.permute.xlu0 %2055 }
 0x234   : > { %1127 = vrot.lane.b32.xlu0 %v1056_v47, %s4537_s21  ;;  %v2133_v38 = vcombine.low %v2044_v24, %v2052_v22  ;;  %v2134_v19 = vcombine.high %v2044_v24, %v2052_v22  ;;  %v2149_v21 = vcombine.low %v2048_v7, %v2056_v29  ;;  %v2150_v26 = vcombine.high %v2048_v7, %v2056_v29 }
 0x235   : > { %v4258_v62 = vpack.i.bf16 %v5270_v18, %v5274_v4  ;;  %v4268_v47 = vpack.i.bf16 %v5281_v56, %v5287_v63 }
 0x236   : > { %v2141_v2 = vrot.slane %v2133_v38, %v4715_v27  ;;  %v2148_v20 = vrot.slane %v2134_v19, %v4715_v27  ;;  %v2157_v46 = vrot.slane %v2149_v21, %v4715_v27  ;;  %v2164_v11 = vrot.slane %v2150_v26, %v4715_v27 }
 0x237   : > { %v1399_v25 = vpop.permute.xlu1 %1398  ;;  %v1403_v53 = vpop.permute.xlu0 %1402  ;;  %v1752_v19 = vcombine.low %v1719_v8, %v1735_v40  ;;  %v2397_v26 = vcombine.low %v2364_v60, %v2380_v30  ;;  %v1091_v8 = vcombine.low %v5205_v44, %v5208_v50  ;;  %v899_v40 = vcombine.high %v5183_v23, %v4528_v28 }
 0x238   : > { %4244 = vrot.lane.b32.xlu0 %v4243_v12, %s6427_s8  ;;  %v2166_v61 = vcombine.high %v2141_v2, %v2157_v46  ;;  %v2181_v51 = vcombine.low %v2148_v20, %v2164_v11  ;;  %v2165_v52 = vcombine.low %v2141_v2, %v2157_v46  ;;  %v901_v2 = vcombine.high %v5163_v9, %v4528_v28 }
 0x239   : > { %v5329_v46 = vrot.slane %v2397_v26, %v4718_v34  ;;  %v1975_v9 = vcombine.high %v5173_v15, %v4528_v28  ;;  %v5361_v26 = vrot.slane %v1091_v8, %v4718_v34 }
 0x23a   : > { %v5314_v20 = vrot.slane %v2166_v61, %v4718_v34  ;;  %v5334_v30 = vrot.slane %v2165_v52, %v4718_v34 }
 0x23b   : > { %v1407_v39 = vpop.permute.xlu1 %1406  ;;  %v1411_v45 = vpop.permute.xlu0 %1410  ;;  %v4298_v61 = vpack.i.bf16 %v901_v2, %v1975_v9  ;;  %v1115_v8 = vcombine.high %v5361_v26, %v4528_v28 }
 0x23c   : > { %v1488_v41 = vcombine.low %v1399_v25, %v1407_v39  ;;  %v1489_v31 = vcombine.high %v1399_v25, %v1407_v39  ;;  %v1504_v24 = vcombine.low %v1403_v53, %v1411_v45  ;;  %v1505_v7 = vcombine.high %v1403_v53, %v1411_v45  ;;  %4259 = vrot.lane.b32.xlu0 %v4258_v62, %s6417_s12 }
 0x23d   : > { %v5311_v62 = vrot.slane %v2181_v51, %v4718_v34  ;;  %v5321_v39 = vrot.slane %v1752_v19, %v4718_v34  ;;  %v900_v51 = vcombine.high %v5238_v54, %v4528_v28 }
 0x23e   : > { %v1496_v48 = vrot.slane %v1488_v41, %v4715_v27  ;;  %v1503_v22 = vrot.slane %v1489_v31, %v4715_v27  ;;  %v1512_v29 = vrot.slane %v1504_v24, %v4715_v27  ;;  %v1519_v13 = vrot.slane %v1505_v7, %v4715_v27 }
 0x23f   : > { %v2258_v59 = vpop.permute.xlu1 %2257  ;;  %v2262_v5 = vpop.permute.xlu0 %2261 }
 0x240   : > { %v1521_v12 = vcombine.high %v1496_v48, %v1512_v29  ;;  %v1536_v38 = vcombine.low %v1503_v22, %v1519_v13  ;;  %4269 = vrot.lane.b32.xlu0 %v4268_v47, %s4518_s19  ;;  %v1520_v21 = vcombine.low %v1496_v48, %v1512_v29  ;;  %v4273_v22 = vpack.i.bf16 %v5321_v39, %v5329_v46 }
 0x241   : > { %v1973_v13 = vcombine.high %v5198_v55, %v4528_v28 }
 0x242   : > { %v5305_v25 = vrot.slane %v1536_v38, %v4718_v34  ;;  %v5308_v53 = vrot.slane %v1521_v12, %v4718_v34  ;;  %v5324_v45 = vrot.slane %v1520_v21, %v4718_v34 }
 0x243   : > { %v2266_v16 = vpop.permute.xlu1 %2265  ;;  %v2270_v3 = vpop.permute.xlu0 %2269  ;;  %v4278_v21 = vpack.i.bf16 %v899_v40, %v1973_v13 }
 0x244   : > { %v4283_v11 = vpack.i.bf16 %v5305_v25, %v5311_v62  ;;  %v4263_v60 = vpack.i.bf16 %v5308_v53, %v5314_v20  ;;  %v2281_v41 = vcombine.low %v2258_v59, %v2266_v16  ;;  %v2297_v31 = vcombine.low %v2262_v5, %v2270_v3 }
 0x245   : > { %v2282_v47 = vcombine.high %v2258_v59, %v2266_v16  ;;  %v2298_v48 = vcombine.high %v2262_v5, %v2270_v3  ;;  %v4293_v29 = vpack.i.bf16 %v5324_v45, %v5334_v30 }
 0x246   : > { %4284 = vrot.lane.b32.xlu0 %v4283_v11, %s6429_s20  ;;  %4264 = vrot.lane.b32.xlu1 %v4263_v60, %s6417_s12  ;;  %v5349_v44 = vrot.slane %v2281_v41, %v4715_v27  ;;  %v5352_v15 = vrot.slane %v2297_v31, %v4715_v27  ;;  %s4539_s12 = smov 54   ;;  %v1974_v41 = vcombine.high %v5246_v33, %v4528_v28 }
 0x247   : > { %v1613_v24 = vpop.permute.xlu1 %1612  ;;  %v1617_v7 = vpop.permute.xlu0 %1616  ;;  %v2296_v38 = vrot.slane %v2282_v47, %v4715_v27  ;;  %v2312_v19 = vrot.slane %v2298_v48, %v4715_v27 }
 0x248   : > { %v2314_v11 = vcombine.high %v5349_v44, %v5352_v15 }
 0x249   : > { %v2329_v9 = vcombine.low %v2296_v38, %v2312_v19 }
 0x24a   : > { %4274 = vrot.lane.b32.xlu1 %v4273_v22, %s6429_s20  ;;  %4294 = vrot.lane.b32.xlu0 %v4293_v29, %s4518_s19  ;;  %v2328_v22 = vrot.slane %v2314_v11, %v4718_v34  ;;  %v1116_v29 = vcombine.high %v5235_v32, %v4528_v28 }
 0x24b   : > { %v1621_v23 = vpop.permute.xlu1 %1620  ;;  %v1625_v50 = vpop.permute.xlu0 %1624 }
 0x24c   : > { %v1636_v59 = vcombine.low %v1613_v24, %v1621_v23  ;;  %v1637_v5 = vcombine.high %v1613_v24, %v1621_v23  ;;  %v1652_v12 = vcombine.low %v1617_v7, %v1625_v50  ;;  %v1653_v55 = vcombine.high %v1617_v7, %v1625_v50 }
 0x24d   : > { %v4288_v7 = vpack.i.bf16 %v900_v51, %v1974_v41  ;;  %v2330_v23 = vcombine.high %v2296_v38, %v2312_v19  ;;  %v5391_v51 = vrot.slane %v2329_v9, %v4718_v34 }
 0x24e   : > { %v5364_v52 = vrot.slane %v1636_v59, %v4715_v27  ;;  %v1651_v16 = vrot.slane %v1637_v5, %v4715_v27  ;;  %v5368_v3 = vrot.slane %v1652_v12, %v4715_v27  ;;  %v1667_v54 = vrot.slane %v1653_v55, %v4715_v27  ;;  %4279 = vrot.lane.b32.xlu1 %v4278_v21, %s6421_s22 }
 0x24f   : > { %4299 = vrot.lane.b32.xlu0 %v4298_v61, %s4539_s12  ;;  %v2042_v60 = vpop.permute.xlu1 %2041  ;;  %v2046_v2 = vpop.permute.xlu0 %2045  ;;  %v2344_v38 = vrot.slane %v2330_v23, %v4718_v34 }
 0x250   : > { %v1669_v31 = vcombine.high %v5364_v52, %v5368_v3  ;;  %v1684_v24 = vcombine.low %v1651_v16, %v1667_v54  ;;  %v1685_v33 = vcombine.high %v1651_v16, %v1667_v54 }
 0x252   : > { %v1683_v40 = vrot.slane %v1669_v31, %v4718_v34  ;;  %4289 = vrot.lane.b32.xlu1 %v4288_v7, %s6419_s18  ;;  %v5388_v61 = vrot.slane %v1684_v24, %v4718_v34  ;;  %v1699_v16 = vrot.slane %v1685_v33, %v4718_v34 }
 0x253   : > { %1151 = vrot.lane.b32.xlu0 %v1115_v8, %s6421_s22  ;;  %v2050_v47 = vpop.permute.xlu1 %2049  ;;  %v2054_v48 = vpop.permute.xlu0 %2053 }
 0x254   : > { %v4303_v13 = vpack.i.bf16 %v1683_v40, %v2328_v22  ;;  %v2065_v50 = vcombine.low %v2042_v60, %v2050_v47  ;;  %v2066_v59 = vcombine.high %v2042_v60, %v2050_v47  ;;  %v2081_v5 = vcombine.low %v2046_v2, %v2054_v48 }
 0x255   : > { %v2082_v12 = vcombine.high %v2046_v2, %v2054_v48  ;;  %v4313_v32 = vpack.i.bf16 %v5388_v61, %v5391_v51  ;;  %v4323_v9 = vpack.i.bf16 %v1699_v16, %v2344_v38 }
 0x256   : > { %1159 = vrot.lane.b32.xlu1 %v1116_v29, %s6419_s18  ;;  %v5400_v19 = vrot.slane %v2065_v50, %v4715_v27  ;;  %v2080_v54 = vrot.slane %v2066_v59, %v4715_v27  ;;  %v5404_v11 = vrot.slane %v2081_v5, %v4715_v27 }
 0x257   : > { %4304 = vrot.lane.b32.xlu0 %v4303_v13, %s4530_s23  ;;  %v1397_v55 = vpop.permute.xlu1 %1396  ;;  %v1401_v21 = vpop.permute.xlu0 %1400  ;;  %v2096_v60 = vrot.slane %v2082_v12, %v4715_v27 }
 0x258   : > { %v2098_v13 = vcombine.high %v5400_v19, %v5404_v11 }
 0x259   : > { %v2114_v23 = vcombine.high %v2080_v54, %v2096_v60 }
 0x25b   : > { %4314 = vrot.lane.b32.xlu0 %v4313_v32, %s4532_s11  ;;  %v1405_v2 = vpop.permute.xlu1 %1404  ;;  %v1409_v41 = vpop.permute.xlu0 %1408  ;;  %v5426_v32 = vrot.slane %v2114_v23, %v4718_v34 }
 0x25c   : > { %v1420_v31 = vcombine.low %v1397_v55, %v1405_v2  ;;  %v1421_v24 = vcombine.high %v1397_v55, %v1405_v2  ;;  %v1436_v7 = vcombine.low %v1401_v21, %v1409_v41  ;;  %v1437_v8 = vcombine.high %v1401_v21, %v1409_v41 }
 0x25d   : > { %v2113_v21 = vcombine.low %v2080_v54, %v2096_v60  ;;  %v2112_v2 = vrot.slane %v2098_v13, %v4718_v34  ;;  %v2189_v54 = vcombine.high %v5334_v30, %v4528_v28  ;;  %v2346_v30 = vcombine.high %v2328_v22, %v4528_v28 }
 0x25e   : > { %v5409_v47 = vrot.slane %v1420_v31, %v4715_v27  ;;  %v1435_v48 = vrot.slane %v1421_v24, %v4715_v27  ;;  %v5413_v33 = vrot.slane %v1436_v7, %v4715_v27  ;;  %v1451_v29 = vrot.slane %v1437_v8, %v4715_v27 }
 0x25f   : > { %4324 = vrot.lane.b32.xlu0 %v4323_v9, %s6423_s16  ;;  %v1544_v24 = vcombine.high %v5324_v45, %v4528_v28  ;;  %v5441_v60 = vrot.slane %v2113_v21, %v4718_v34  ;;  %v1760_v8 = vcombine.high %v5281_v56, %v4528_v28  ;;  %v5453_v13 = vpop.permute.xlu0 %4164  ;;  %v1761_v56 = vcombine.high %v5270_v18, %v4528_v28 }
 0x260   : > { %v1453_v50 = vcombine.high %v5409_v47, %v5413_v33  ;;  %v1469_v59 = vcombine.high %v1435_v48, %v1451_v29  ;;  %v1468_v5 = vcombine.low %v1435_v48, %v1451_v29  ;;  %v1701_v48 = vcombine.high %v1683_v40, %v4528_v28 }
 0x261   : > { %v4338_v9 = vpack.i.bf16 %v1544_v24, %v2189_v54  ;;  %v2405_v29 = vcombine.high %v5287_v63, %v4528_v28  ;;  %v2406_v40 = vcombine.high %v5274_v4, %v4528_v28  ;;  %v2130_v63 = vcombine.high %v2112_v2, %v4528_v28 }
 0x262   : > { %v5422_v12 = vrot.slane %v1469_v59, %v4718_v34  ;;  %v1467_v55 = vrot.slane %v1453_v50, %v4718_v34  ;;  %v5434_v7 = vrot.slane %v1468_v5, %v4718_v34  ;;  %v4373_v23 = vpack.i.bf16 %v1701_v48, %v2346_v30  ;;  %v5465_v5 = vpop.permute.xlu1 %4154 }
 0x263   : > { %v4333_v50 = vpack.i.bf16 %v1760_v8, %v2405_v29  ;;  %v1545_v22 = vcombine.high %v5308_v53, %v4528_v28  ;;  %v4343_v21 = vpack.i.bf16 %v1761_v56, %v2406_v40  ;;  %v2190_v4 = vcombine.high %v5314_v20, %v4528_v28 }
 0x264   : > { %v4328_v41 = vpack.i.bf16 %v5422_v12, %v5426_v32  ;;  %v4308_v31 = vpack.i.bf16 %v1467_v55, %v2112_v2  ;;  %v4318_v45 = vpack.i.bf16 %v5434_v7, %v5441_v60  ;;  %v1485_v59 = vcombine.high %v1467_v55, %v4528_v28 }
 0x265   : > { %v2348_v55 = vcombine.high %v2344_v38, %v4528_v28  ;;  %v1762_v53 = vcombine.high %v5321_v39, %v4528_v28  ;;  %v1668_v2 = vcombine.low %v5364_v52, %v5368_v3  ;;  %v4348_v24 = vpack.i.bf16 %v1545_v22, %v2190_v4 }
 0x266   : > { %4329 = vrot.lane.b32.xlu0 %v4328_v41, %s6423_s16  ;;  %4309 = vrot.lane.b32.xlu1 %v4308_v31, %s4530_s23  ;;  %v4378_v18 = vpack.i.bf16 %v1485_v59, %v2130_v63  ;;  %v1703_v41 = vcombine.high %v1699_v16, %v4528_v28  ;;  %v5468_v31 = vpop.permute.xlu0 %4179  ;;  %v2313_v16 = vcombine.low %v5349_v44, %v5352_v15  ;;  %v5483_v8 = vpop.permute.xlu1 %4159  ;;  %s6462_s16 = smov 64  }
 0x267   : > { %v2407_v20 = vcombine.high %v5329_v46, %v4528_v28  ;;  %v5490_v39 = vrot.slane %v1668_v2, %v4718_v34  ;;  %v1452_v52 = vcombine.low %v5409_v47, %v5413_v33  ;;  %v1546_v44 = vcombine.high %v5305_v25, %v4528_v28 }
 0x268   : > { %v4393_v54 = vpack.i.bf16 %v1703_v41, %v2348_v55  ;;  %v5497_v46 = vrot.slane %v2313_v16, %v4718_v34  ;;  %v2097_v15 = vcombine.low %v5400_v19, %v5404_v11  ;;  %v2191_v47 = vcombine.high %v5311_v62, %v4528_v28  ;;  %v5557_v41 = vld [vmem:[%s4685_s15 + $0x10] sm:$0xff] }
 0x269   : > { %v4353_v3 = vpack.i.bf16 %v1762_v53, %v2407_v20  ;;  %v1058_v33 = vcombine.high %v5186_v49, %v4528_v28  ;;  %v5511_v25 = vrot.slane %v1452_v52, %v4718_v34  ;;  %v1700_v19 = vcombine.high %v5490_v39, %v4528_v28  ;;  %6458 = vst [vmem:[#allocation10_spill] sm:$0xff] %v5557_v41 }
 0x26a   : > { %4339 = vrot.lane.b32.xlu0 %v4338_v9, %s6421_s22  ;;  %4319 = vrot.lane.b32.xlu1 %v4318_v45, %s4532_s11  ;;  %v5487_v38 = vpop.permute.xlu0 %4184  ;;  %v6457_v9 = vpack.i.bf16 %v4955_v58, %v4943_v1  ;;  %v5513_v45 = vpop.permute.xlu1 %4169  ;;  %v4358_v48 = vpack.i.bf16 %v1546_v44, %v2191_v47  ;;  %v5520_v1 = vrot.slane %v2097_v15, %v4718_v34  ;;  %v5625_v47 = vld [vmem:[%s4685_s15 + $0x18] sm:$0xff] }
 0x26b   : > { %v2345_v58 = vcombine.high %v5497_v46, %v4528_v28  ;;  %v1484_v62 = vcombine.high %v5511_v25, %v4528_v28  ;;  %v1702_v59 = vcombine.high %v5388_v61, %v4528_v28  ;;  %v2347_v63 = vcombine.high %v5391_v51, %v4528_v28  ;;  %6467 = vst [vmem:[#allocation12_spill] sm:$0xff] %v5625_v47 }
 0x26c   : > { %v2129_v56 = vcombine.high %v5520_v1, %v4528_v28  ;;  %v2131_v61 = vcombine.high %v5441_v60, %v4528_v28  ;;  %v1060_v51 = vcombine.high %v5156_v35, %v5165_v42  ;;  %v1076_v4 = vcombine.high %v5158_v36, %v5167_v43 }
 0x26d   : > { %v4363_v49 = vpack.i.bf16 %v1700_v19, %v2345_v58  ;;  %v4383_v22 = vpack.i.bf16 %v1702_v59, %v2347_v63  ;;  %v1487_v35 = vcombine.high %v5422_v12, %v4528_v28  ;;  %v6460_v36 = vpack.i.bf16 %v4949_v10, %v4940_v37  ;;  %v5670_v63 = vld [vmem:[%s4685_s15 + $0x8] sm:$0xff] }
 0x26e   : > { %4374 = vrot.lane.b32.xlu0 %v4373_v23, %s4537_s21  ;;  %4334 = vrot.lane.b32.xlu1 %v4333_v50, %s6421_s22  ;;  %v5517_v11 = vpop.permute.xlu0 %4204  ;;  %v5530_v30 = vpop.permute.xlu1 %4174  ;;  %v2513_v23 = vld [vmem:[%s6398_s4] sm:$0xf]  ;;  %v4368_v50 = vpack.i.bf16 %v1484_v62, %v2129_v56  ;;  %v1074_v60 = vrot.slane %v1060_v51, %v4715_v27  ;;  %v1090_v2 = vrot.slane %v1076_v4, %v4715_v27  ;;  %s6461_s22 = smov 80  }
 0x26f   : > { %v2132_v43 = vcombine.high %v5426_v32, %v4528_v28  ;;  %6469 = vst [vmem:[#allocation14_spill] sm:$0xff] %v5670_v63 }
 0x271   : > { %v4408_v16 = vpack.i.bf16 %v1487_v35, %v2132_v43 }
 0x272   : > { %4344 = vrot.lane.b32.xlu1 %v4343_v21, %s6419_s18  ;;  %4379 = vrot.lane.b32.xlu0 %v4378_v18, %s4537_s21  ;;  %v1486_v21 = vcombine.high %v5434_v7, %v4528_v28 }
 0x274   : > { %v4388_v55 = vpack.i.bf16 %v1486_v21, %v2131_v61 }
 0x276   : > { %4349 = vrot.lane.b32.xlu1 %v4348_v24, %s6419_s18  ;;  %4394 = vrot.lane.b32.xlu0 %v4393_v54, %s6427_s8  ;;  %s6459_s18 = smov 96   ;;  %v1107_v24 = vcombine.low %v1074_v60, %v1090_v2 }
 0x278   : > { %v1114_v10 = vrot.slane %v1107_v24, %v4718_v34  ;;  %v4166_v34 = vunpack.i.l.bf16 %v5453_v13 }
 0x27a   : > { %4354 = vrot.lane.b32.xlu1 %v4353_v3, %s4539_s12  ;;  %4399 = vrot.lane.b32.xlu0 %v6457_v9, %s4518_s19  ;;  %v1117_v32 = vcombine.high %v1114_v10, %v4528_v28  ;;  %v5614_v9 = vld [vmem:[%s4685_s15] sm:$0xff]  ;;  %s6500_s15 = smov 98  }
 0x27b   : > { %6465 = vst [vmem:[#allocation11_spill] sm:$0xff] %v5614_v9 }
 0x27e   : > { %4359 = vrot.lane.b32.xlu1 %v4358_v48, %s4539_s12  ;;  %1143 = vrot.lane.b32.xlu0 %v1058_v33, %s6427_s8 }
 0x281   : > { %v5528_v29 = vpop.permute.xlu0 %4209 }
 0x282   : > { %4364 = vrot.lane.b32.xlu1 %v4363_v49, %s4536_s9  ;;  %1147 = vrot.lane.b32.xlu0 %v5361_v26, %s4518_s19  ;;  %v5547_v26 = vpop.permute.xlu1 %4189 }
 0x286   : > { %v5542_v40 = vpop.permute.xlu0 %1123  ;;  %2516 = vperm.xlu0 %4152, %v2513_v23   ;;  %4369 = vrot.lane.b32.xlu1 %v4368_v50, %s4536_s9  ;;  %v5567_v53 = vpop.permute.xlu1 %4194 }
 0x28a   : > { %v5551_v18 = vpop.permute.xlu0 %4219  ;;  %4384 = vrot.lane.b32.xlu1 %v4383_v22, %s6425_s29  ;;  %2651 = vrot.lane.b32.xlu0 %v5557_v41, %s4518_s19  ;;  %v5586_v54 = vpop.permute.xlu1 %4199 }
 0x28e   : > { %v5565_v7 = vpop.permute.xlu0 %1131  ;;  %4389 = vrot.lane.b32.xlu1 %v4388_v55, %s6425_s29  ;;  %2657 = vrot.lane.b32.xlu0 %v5557_v41, %s6459_s18  ;;  %v5593_v37 = vpop.permute.xlu1 %4214  ;;  %s6463_s29 = smov 48  }
 0x292   : > { %v5576_v42 = vpop.permute.xlu0 %1139  ;;  %4404 = vrot.lane.b32.xlu1 %v6460_v36, %s4539_s12  ;;  %2663 = vrot.lane.b32.xlu0 %v5557_v41, %s6461_s22  ;;  %v5604_v3 = vpop.permute.xlu1 %4224 }
 0x296   : > { %v5588_v20 = vpop.permute.xlu0 %4229  ;;  %4409 = vrot.lane.b32.xlu1 %v4408_v16, %s6427_s8  ;;  %2669 = vrot.lane.b32.xlu0 %v5557_v41, %s6462_s16  ;;  %s6464_s8 = smov 32   ;;  %v5611_v15 = vpop.permute.xlu1 %4249 }
 0x297   : > { %v4252_v2 = vunpack.i.h.bf16 %v5611_v15 }
 0x29a   : > { %v5596_v12 = vpop.permute.xlu0 %1119  ;;  %1163 = vrot.lane.b32.xlu1 %v1114_v10, %s6429_s20  ;;  %2675 = vrot.lane.b32.xlu0 %v5557_v41, %s6463_s29  ;;  %s6466_s20 = smov 16   ;;  %v5629_v33 = vpop.permute.xlu1 %4254 }
 0x29e   : > { %v5602_v52 = vpop.permute.xlu0 %4234  ;;  %1167 = vrot.lane.b32.xlu1 %v1117_v32, %s4539_s12  ;;  %2681 = vrot.lane.b32.xlu0 %v5557_v41, %s6464_s8  ;;  %v5637_v19 = vpop.permute.xlu1 %1135 }
 0x2a2   : > { %v5609_v44 = vpop.permute.xlu0 %4239  ;;  %2649 = vrot.lane.b32.xlu1 %v5614_v9, %s4518_s19  ;;  %2687 = vrot.lane.b32.xlu0 %v5557_v41, %s6466_s20  ;;  %v5649_v49 = vpop.permute.xlu1 %1155 }
 0x2a3   : > { %6468 = vst [vmem:[#allocation13_spill] sm:$0xff] %v5649_v49  ;;  %v4242_v51 = vunpack.i.h.bf16 %v5609_v44  ;;  %v4197_v49 = vunpack.i.h.bf16 %v5567_v53 }
 0x2a6   : > { %v5620_v28 = vpop.permute.xlu0 %1127  ;;  %2655 = vrot.lane.b32.xlu1 %v5614_v9, %s6459_s18  ;;  %2695 = vrot.lane.b32.xlu0 %v5625_v47, %s4518_s19 }
 0x2aa   : > { %v5631_v48 = vpop.permute.xlu0 %4244  ;;  %2661 = vrot.lane.b32.xlu1 %v5614_v9, %s6461_s22  ;;  %2701 = vrot.lane.b32.xlu0 %v5625_v47, %s6459_s18 }
 0x2ae   : > { %v5639_v58 = vpop.permute.xlu0 %4259  ;;  %2667 = vrot.lane.b32.xlu1 %v5614_v9, %s6462_s16  ;;  %2707 = vrot.lane.b32.xlu0 %v5625_v47, %s6461_s22 }
 0x2b2   : > { %2673 = vrot.lane.b32.xlu1 %v5614_v9, %s6463_s29  ;;  %2713 = vrot.lane.b32.xlu0 %v5625_v47, %s6462_s16  ;;  %v5651_v62 = vpop.permute.xlu0 %4269 }
 0x2b6   : > { %2679 = vrot.lane.b32.xlu1 %v5614_v9, %s6464_s8  ;;  %2719 = vrot.lane.b32.xlu0 %v5625_v47, %s6463_s29 }
 0x2b8   : > { %v5657_v56 = vpop.permute.xlu1 %4264  ;;  %v5659_v23 = vpop.permute.xlu0 %4284 }
 0x2ba   : > { %2685 = vrot.lane.b32.xlu1 %v5614_v9, %s6466_s20  ;;  %2725 = vrot.lane.b32.xlu0 %v5625_v47, %s6464_s8  ;;  %v4227_v9 = vunpack.i.h.bf16 %v5604_v3 }
 0x2bc   : > { %v5665_v50 = vpop.permute.xlu1 %4274  ;;  %v5667_v59 = vpop.permute.xlu0 %4294 }
 0x2be   : > { %2693 = vrot.lane.b32.xlu1 %v5670_v63, %s4518_s19  ;;  %2731 = vrot.lane.b32.xlu0 %v5625_v47, %s6466_s20  ;;  %v4186_v47 = vunpack.i.l.bf16 %v5487_v38 }
 0x2c0   : > { %v5676_v22 = vpop.permute.xlu1 %4279 }
 0x2c1   : > { %v5678_v21 = vpop.permute.xlu0 %4299  ;;  %v6431_v61 = vunpack.i.h.bf16 %v5676_v22 }
 0x2c2   : > { %2699 = vrot.lane.b32.xlu1 %v5670_v63, %s6459_s18  ;;  %v4302_v43 = vunpack.i.h.bf16 %v5678_v21 }
 0x2c3   : > { %v963_v35 = vsel %vm735_vm3, %v6431_v61, %v4242_v51  ;;  %v4156_v61 = vunpack.i.l.bf16 %v5465_v5  ;;  %v4187_v51 = vunpack.i.h.bf16 %v5487_v38 }
 0x2c4   : > { %v5684_v4 = vpop.permute.xlu1 %4289 }
 0x2c5   : > { %v5686_v55 = vpop.permute.xlu0 %1151  ;;  %v4292_v60 = vunpack.i.h.bf16 %v5684_v4 }
 0x2c6   : > { %2705 = vrot.lane.b32.xlu1 %v5670_v63, %s6461_s22  ;;  %s6499_s22 = smov 12  }
 0x2c7   : > { %v964_v36 = vsel %vm737_vm4, %v963_v35, %v4292_v60  ;;  %v4192_v35 = vunpack.i.h.bf16 %v5547_v26 }
 0x2c8   : > { %v965_v24 = vsel %vm739_vm5, %v964_v36, %v4252_v2  ;;  %v5712_v60 = vpop.permute.xlu1 %1159  ;;  %v4191_v36 = vunpack.i.l.bf16 %v5547_v26  ;;  %v4167_v26 = vunpack.i.h.bf16 %v5453_v13  ;;  %v4226_v13 = vunpack.i.l.bf16 %v5604_v3 }
 0x2c9   : > { %v5698_v16 = vpop.permute.xlu0 %4304  ;;  %v5701_v10 = vsel %vm741_vm6, %v965_v24, %v4302_v43  ;;  %6471 = vst [vmem:[#allocation16_spill] sm:$0xff] %v5712_v60  ;;  %v4157_v43 = vunpack.i.h.bf16 %v5465_v5  ;;  %v6472_v24 = vunpack.i.h.bf16 %v5468_v31  ;;  %v718_v5 = vsel %vm717_vm7, %v5074_v17, %v4192_v35 }
 0x2ca   : > { %6470 = vst [vmem:[#allocation15_spill] sm:$0xff] %v5701_v10  ;;  %2711 = vrot.lane.b32.xlu1 %v5670_v63, %s6462_s16  ;;  %v1383_v38 = vsel %vm717_vm7, %v5063_v6, %v4191_v36  ;;  %v6474_v10 = vunpack.i.l.bf16 %v5468_v31  ;;  %v954_v35 = vsel %vm717_vm7, %v5114_v57, %v4227_v9  ;;  %v4232_v3 = vunpack.i.h.bf16 %v5588_v20 }
 0x2cb   : > { %v736_v60 = vsel %vm735_vm3, %v6472_v24, %v4157_v43  ;;  %v4172_v43 = vunpack.i.h.bf16 %v5513_v45  ;;  %v4171_v24 = vunpack.i.l.bf16 %v5513_v45  ;;  %v720_v36 = vsel %vm719_vm8, %v718_v5, %v4167_v26 }
 0x2cc   : > { %v1392_v41 = vsel %vm735_vm3, %v6474_v10, %v4156_v61  ;;  %v5749_v17 = vsel %vm737_vm4, %v736_v60, %v4187_v51  ;;  %v1384_v61 = vsel %vm719_vm8, %v1383_v38, %v4166_v34  ;;  %v4212_v10 = vunpack.i.h.bf16 %v5528_v29 }
 0x2cd   : > { %v5705_v32 = vpop.permute.xlu0 %4314  ;;  %v5752_v6 = vsel %vm737_vm4, %v1392_v41, %v4186_v47  ;;  %v1170_v45 = vsel %vm717_vm7, %v5213_v0, %v5596_v12  ;;  %v722_v47 = vsel %vm721_vm9, %v720_v36, %v4197_v49  ;;  %v4202_v57 = vunpack.i.h.bf16 %v5586_v54 }
 0x2ce   : > { %2717 = vrot.lane.b32.xlu1 %v5670_v63, %s6463_s29  ;;  %v2028_v9 = vsel %vm717_vm7, %v5123_v14, %v4226_v13  ;;  %v4231_v34 = vunpack.i.l.bf16 %v5588_v20  ;;  %v4201_v60 = vunpack.i.l.bf16 %v5586_v54  ;;  %v4211_v0 = vunpack.i.l.bf16 %v5528_v29  ;;  %s6501_s29 = smov 26  }
 0x2cf   : > { %v955_v12 = vsel %vm719_vm8, %v954_v35, %v4212_v10  ;;  %v4177_v26 = vunpack.i.h.bf16 %v5530_v30  ;;  %v4237_v49 = vunpack.i.h.bf16 %v5602_v52  ;;  %v1171_v38 = vsel %vm719_vm8, %v1170_v45, %v5542_v40 }
 0x2d0   : > { %v956_v5 = vsel %vm721_vm9, %v955_v12, %v4232_v3  ;;  %v724_v14 = vsel %vm723_vm10, %v722_v47, %v4172_v43  ;;  %v4217_v20 = vunpack.i.h.bf16 %v5593_v37  ;;  %v2029_v54 = vsel %vm719_vm8, %v2028_v9, %v4211_v0 }
 0x2d1   : > { %v5714_v2 = vpop.permute.xlu0 %4324  ;;  %v1172_v29 = vsel %vm721_vm9, %v1171_v38, %v5620_v28  ;;  %v726_v35 = vsel %vm725_vm11, %v724_v14, %v4202_v57  ;;  %v2030_v40 = vsel %vm721_vm9, %v2029_v54, %v4231_v34  ;;  %v4236_v36 = vunpack.i.l.bf16 %v5602_v52 }
 0x2d2   : > { %2723 = vrot.lane.b32.xlu1 %v5670_v63, %s6464_s8  ;;  %v4176_v43 = vunpack.i.l.bf16 %v5530_v30  ;;  %v4216_v10 = vunpack.i.l.bf16 %v5593_v37  ;;  %v957_v28 = vsel %vm723_vm10, %v956_v5, %v4217_v20  ;;  %v4207_v45 = vunpack.i.h.bf16 %v5517_v11 }
 0x2d3   : > { %v958_v47 = vsel %vm725_vm11, %v957_v28, %v4237_v49  ;;  %v4247_v57 = vunpack.i.h.bf16 %v5631_v48  ;;  %v4206_v52 = vunpack.i.l.bf16 %v5517_v11  ;;  %v728_v30 = vsel %vm727_vm12, %v726_v35, %v4177_v26 }
 0x2d4   : > { %v4222_v9 = vunpack.i.h.bf16 %v5551_v18  ;;  %v2031_v37 = vsel %vm723_vm10, %v2030_v40, %v4216_v10  ;;  %v4221_v0 = vunpack.i.l.bf16 %v5551_v18  ;;  %v4246_v12 = vunpack.i.l.bf16 %v5631_v48 }
 0x2d5   : > { %v6445_v26 = vunpack.i.l.bf16 %v5676_v22  ;;  %v4291_v14 = vunpack.i.l.bf16 %v5684_v4  ;;  %v730_v18 = vsel %vm729_vm13, %v728_v30, %v4207_v45  ;;  %v4257_v48 = vunpack.i.h.bf16 %v5629_v33 }
 0x2d6   : > { %2729 = vrot.lane.b32.xlu1 %v5670_v63, %s6466_s20  ;;  %v959_v11 = vsel %vm727_vm12, %v958_v47, %v4222_v9  ;;  %v4241_v54 = vunpack.i.l.bf16 %v5609_v44  ;;  %v4261_v35 = vunpack.i.l.bf16 %v5639_v58  ;;  %v4251_v40 = vunpack.i.l.bf16 %v5611_v15 }
 0x2d7   : > { %v960_v38 = vsel %vm729_vm13, %v959_v11, %v4247_v57  ;;  %v4262_v44 = vunpack.i.h.bf16 %v5639_v58  ;;  %v4266_v57 = vunpack.i.l.bf16 %v5657_v56  ;;  %v4276_v30 = vunpack.i.l.bf16 %v5665_v50 }
 0x2d8   : > { %v5732_v27 = vpop.permute.xlu1 %4309  ;;  %v5734_v63 = vpop.permute.xlu0 %4329  ;;  %v2037_v10 = vsel %vm735_vm3, %v6445_v26, %v4241_v54 }
 0x2d9   : > { %6473 = vst [vmem:[#allocation17_spill] sm:$0xff] %v5734_v63  ;;  %v4196_v63 = vunpack.i.l.bf16 %v5567_v53  ;;  %v2038_v47 = vsel %vm737_vm4, %v2037_v10, %v4291_v14  ;;  %v4307_v10 = vunpack.i.h.bf16 %v5698_v16  ;;  %v4311_v58 = vunpack.i.l.bf16 %v5732_v27 }
 0x2da   : > { %v2039_v14 = vsel %vm739_vm5, %v2038_v47, %v4251_v40  ;;  %v4317_v40 = vunpack.i.h.bf16 %v5705_v32  ;;  %v4316_v47 = vunpack.i.l.bf16 %v5705_v32 }
 0x2db   : > { %v1385_v51 = vsel %vm721_vm9, %v1384_v61, %v4196_v63 }
 0x2dc   : > { %v5763_v53 = vpop.permute.xlu1 %4319  ;;  %v5765_v41 = vpop.permute.xlu0 %4339  ;;  %v1386_v3 = vsel %vm723_vm10, %v1385_v51, %v4171_v24  ;;  %v1173_v24 = vsel %vm723_vm10, %v1172_v29, %v5565_v7  ;;  %v2032_v7 = vsel %vm725_vm11, %v2031_v37, %v4236_v36 }
 0x2dd   : > { %v1387_v61 = vsel %vm725_vm11, %v1386_v3, %v4201_v60  ;;  %v1174_v49 = vsel %vm725_vm11, %v1173_v24, %v5637_v19  ;;  %v2033_v29 = vsel %vm727_vm12, %v2032_v7, %v4221_v0  ;;  %v4267_v24 = vunpack.i.h.bf16 %v5657_v56 }
 0x2de   : > { %v1388_v60 = vsel %vm727_vm12, %v1387_v61, %v4176_v43  ;;  %v5834_v4 = vsel %vm729_vm13, %v2033_v29, %v4246_v12  ;;  %v1175_v43 = vsel %vm727_vm12, %v1174_v49, %v5576_v42  ;;  %v961_v61 = vsel %vm731_vm14, %v960_v38, %v4257_v48 }
 0x2df   : > { %v1389_v36 = vsel %vm729_vm13, %v1388_v60, %v4206_v52  ;;  %v4287_v52 = vunpack.i.h.bf16 %v5659_v23  ;;  %v6475_v60 = vunpack.i.h.bf16 %v5676_v22  ;;  %v4286_v49 = vunpack.i.l.bf16 %v5659_v23 }
 0x2e0   : > { %v5786_v63 = vpop.permute.xlu1 %4334  ;;  %v5788_v13 = vpop.permute.xlu0 %4374  ;;  %v4277_v38 = vunpack.i.h.bf16 %v5665_v50  ;;  %v4301_v48 = vunpack.i.l.bf16 %v5678_v21  ;;  %v6447_v54 = vunpack.i.l.bf16 %v5765_v41  ;;  %v4342_v32 = vunpack.i.h.bf16 %v5765_v41 }
 0x2e1   : > { %v6446_v5 = vunpack.i.l.bf16 %v5786_v63  ;;  %v962_v0 = vsel %vm733_vm15, %v961_v61, %v6475_v60 }
 0x2e2   : > { %v2475_v61 = vrot.slane %v962_v0, 4 }
 0x2e3   : > { %v2469_v15 = vsel %vm735_vm3, %v6446_v5, %v4261_v35 }
 0x2e4   : > { %v5807_v34 = vpop.permute.xlu1 %4344  ;;  %v5809_v51 = vpop.permute.xlu0 %4379 }
 0x2e5   : > { %v4346_v20 = vunpack.i.l.bf16 %v5807_v34 }
 0x2e7   : > { %v2470_v42 = vsel %vm737_vm4, %v2469_v15, %v4346_v20  ;;  %v4306_v15 = vunpack.i.l.bf16 %v5698_v16  ;;  %v6476_v16 = vunpack.i.l.bf16 %v5468_v31 }
 0x2e8   : > { %v5828_v3 = vpop.permute.xlu1 %4349  ;;  %v5830_v19 = vpop.permute.xlu0 %4394  ;;  %v2471_v20 = vsel %vm739_vm5, %v2470_v42, %v4276_v30  ;;  %v5877_v42 = vsel %vm741_vm6, %v2039_v14, %v4301_v48  ;;  %v4377_v14 = vunpack.i.h.bf16 %v5788_v13 }
 0x2e9   : > { %v4351_v0 = vunpack.i.l.bf16 %v5828_v3 }
 0x2ec   : > { %v5855_v9 = vpop.permute.xlu1 %4354  ;;  %v4400_v37 = vpop.permute.xlu0 %4399 }
 0x2ed   : > { %v4356_v7 = vunpack.i.l.bf16 %v5855_v9  ;;  %v4402_v12 = vunpack.i.h.bf16 %v4400_v37  ;;  %v4401_v11 = vunpack.i.l.bf16 %v4400_v37 }
 0x2ef   : > { %v1390_v29 = vsel %vm731_vm14, %v1389_v36, %v4401_v11  ;;  %v2472_v35 = vsel %vm741_vm6, %v2471_v20, %v4356_v7  ;;  %v732_v21 = vsel %vm731_vm14, %v730_v18, %v4402_v12  ;;  %v4312_v11 = vunpack.i.h.bf16 %v5732_v27 }
 0x2f0   : > { %v5871_v37 = vpop.permute.xlu1 %4359  ;;  %v1144_v60 = vpop.permute.xlu0 %1143  ;;  %v2511_v26 = vpack.c.bf16 %v2472_v35, %v2472_v35  ;;  %v1391_v7 = vsel %vm733_vm15, %v1390_v29, %v6476_v16  ;;  %v2253_v18 = vsel %vm735_vm3, %v6447_v54, %v4266_v57  ;;  %v4337_v12 = vunpack.i.h.bf16 %v5786_v63 }
 0x2f1   : > { %v4347_v20 = vunpack.i.h.bf16 %v5807_v34  ;;  %v1176_v48 = vsel %vm729_vm13, %v1175_v43, %v1144_v60  ;;  %v2481_v28 = vrot.slane %v1391_v7, 4  ;;  %v4376_v57 = vunpack.i.l.bf16 %v5788_v13 }
 0x2f2   : > { %4035 = vmatprep.subr.msk.bf16.mxu1 %vm2523_vm0, %v2511_v26  ;;  %v6477_v26 = vunpack.i.h.bf16 %v5468_v31  ;;  %v2254_v54 = vsel %vm737_vm4, %v2253_v18, %v4351_v0  ;;  %v4361_v36 = vunpack.i.l.bf16 %v5871_v37  ;;  %v1824_v13 = vsel %vm735_vm3, %v4337_v12, %v4262_v44 }
 0x2f3   : > { %v1608_v44 = vsel %vm735_vm3, %v4342_v32, %v4267_v24  ;;  %v4382_v7 = vunpack.i.h.bf16 %v5809_v51  ;;  %v4396_v27 = vunpack.i.l.bf16 %v5830_v19 }
 0x2f4   : > { %v4365_v35 = vpop.permute.xlu1 %4364  ;;  %v1148_v29 = vpop.permute.xlu0 %1147  ;;  %v734_v16 = vsel %vm733_vm15, %v732_v21, %v6477_v26 }
 0x2f5   : > { %v4367_v5 = vunpack.i.h.bf16 %v4365_v35  ;;  %v4366_v45 = vunpack.i.l.bf16 %v4365_v35  ;;  %v1177_v30 = vsel %vm731_vm14, %v1176_v48, %v1148_v29  ;;  %v5909_v60 = vsel %vm2497_vm1, %v734_v16, %v2475_v61 }
 0x2f6   : > { %v1178_v34 = vsel %vm733_vm15, %v1177_v30, %v5686_v55 }
 0x2f7   : > { %v1815_v43 = vsel %vm717_vm7, %v5490_v39, %v4367_v5  ;;  %v2460_v31 = vsel %vm717_vm7, %v5497_v46, %v4366_v45  ;;  %v5912_v21 = vsel %vm2497_vm1, %v1178_v34, %v2481_v28  ;;  %v1825_v5 = vsel %vm737_vm4, %v1824_v13, %v4347_v20 }
 0x2f8   : > { %v1816_v30 = vsel %vm719_vm8, %v1815_v43, %v4307_v10  ;;  %v2461_v0 = vsel %vm719_vm8, %v2460_v31, %v4306_v15  ;;  %v4370_v39 = vpop.permute.xlu1 %4369  ;;  %v2506_v46 = vpack.c.bf16 %v5912_v21, %v5909_v60  ;;  %v4352_v45 = vunpack.i.h.bf16 %v5828_v3 }
 0x2f9   : > { %v4372_v28 = vunpack.i.h.bf16 %v4370_v39  ;;  %v4371_v61 = vunpack.i.l.bf16 %v4370_v39  ;;  %v4357_v10 = vunpack.i.h.bf16 %v5855_v9  ;;  %v2255_v15 = vsel %vm739_vm5, %v2254_v54, %v4286_v49 }
 0x2fa   : > { %v2256_v18 = vsel %vm741_vm6, %v2255_v15, %v4361_v36  ;;  %v1817_v3 = vsel %vm721_vm9, %v1816_v30, %v4377_v14  ;;  %v2462_v20 = vsel %vm721_vm9, %v2461_v0, %v4376_v57  ;;  %v1826_v56 = vsel %vm739_vm5, %v1825_v5, %v4277_v38 }
 0x2fb   : > { %v1599_v24 = vsel %vm717_vm7, %v5511_v25, %v4372_v28  ;;  %v2244_v9 = vsel %vm717_vm7, %v5520_v1, %v4371_v61  ;;  %v1609_v54 = vsel %vm737_vm4, %v1608_v44, %v4352_v45  ;;  %v4362_v36 = vunpack.i.h.bf16 %v5871_v37 }
 0x2fc   : > { %v4385_v49 = vpop.permute.xlu1 %4384  ;;  %v1827_v35 = vsel %vm741_vm6, %v1826_v56, %v4357_v10  ;;  %v2494_v29 = vrot.slane %v2256_v18, 4  ;;  %v1818_v50 = vsel %vm723_vm10, %v1817_v3, %v4317_v40  ;;  %v2463_v38 = vsel %vm723_vm10, %v2462_v20, %v4316_v47 }
 0x2fd   : > { %v4387_v14 = vunpack.i.h.bf16 %v4385_v49  ;;  %v4386_v48 = vunpack.i.l.bf16 %v4385_v49  ;;  %v1600_v26 = vsel %vm719_vm8, %v1599_v24, %v4312_v11  ;;  %v2245_v25 = vsel %vm719_vm8, %v2244_v9, %v4311_v58 }
 0x2fe   : > { %v4381_v57 = vunpack.i.l.bf16 %v5809_v51  ;;  %v1610_v37 = vsel %vm739_vm5, %v1609_v54, %v4287_v52  ;;  %v6478_v34 = vunpack.i.h.bf16 %v5714_v2  ;;  %v6479_v47 = vunpack.i.l.bf16 %v5714_v2 }
 0x2ff   : > { %v1819_v1 = vsel %vm725_vm11, %v1818_v50, %v4387_v14  ;;  %v2464_v16 = vsel %vm725_vm11, %v2463_v38, %v4386_v48  ;;  %v4397_v31 = vunpack.i.h.bf16 %v5830_v19  ;;  %v2488_v13 = vrot.slane %v1827_v35, 4  ;;  %v6484_v35 = vld [vmem:[#allocation17_spill] sm:$0xff] }
 0x300   : > { %v1820_v40 = vsel %vm727_vm12, %v1819_v1, %v6478_v34  ;;  %v2465_v11 = vsel %vm727_vm12, %v2464_v16, %v6479_v47  ;;  %v4390_v43 = vpop.permute.xlu1 %4389  ;;  %v1611_v30 = vsel %vm741_vm6, %v1610_v37, %v4362_v36  ;;  %v1601_v51 = vsel %vm721_vm9, %v1600_v26, %v4382_v7  ;;  %v6485_v37 = vld [vmem:[#allocation10_spill] sm:$0xff]  ;;  %v6486_v47 = vld [vmem:[#allocation13_spill] sm:$0xff] }
 0x301   : > { %v5966_v0 = vpop.permute.xlu0 %2516  ;;  %v2466_v23 = vsel %vm729_vm13, %v2465_v11, %v4396_v27  ;;  %v2246_v52 = vsel %vm721_vm9, %v2245_v25, %v4381_v57  ;;  %v6480_v39 = vunpack.i.l.bf16 %v5651_v62  ;;  %v2505_v5 = vsel %vm2497_vm1, %v5877_v42, %v2494_v29 }
 0x302   : > { %v1821_v19 = vsel %vm729_vm13, %v1820_v40, %v4397_v31  ;;  %v4392_v45 = vunpack.i.h.bf16 %v4390_v43  ;;  %v4391_v28 = vunpack.i.l.bf16 %v4390_v43  ;;  %v6481_v61 = vunpack.i.l.bf16 %v5786_v63 }
 0x303   : > { %v2467_v2 = vsel %vm731_vm14, %v2466_v23, %v6480_v39  ;;  %v4322_v44 = vunpack.i.h.bf16 %v5763_v53  ;;  %v4321_v10 = vunpack.i.l.bf16 %v5763_v53  ;;  %v2503_v18 = vsel %vm2497_vm1, %v1611_v30, %v2488_v13 }
 0x304   : > { %v2468_v58 = vsel %vm733_vm15, %v2467_v2, %v6481_v61  ;;  %v4405_v15 = vpop.permute.xlu1 %4404  ;;  %v4161_v3 = vunpack.i.l.bf16 %v5483_v8  ;;  %v4256_v42 = vunpack.i.l.bf16 %v5629_v33  ;;  %v6482_v20 = vunpack.i.h.bf16 %v5483_v8 }
 0x305   : > { %v2510_v7 = vpack.c.bf16 %v2468_v58, %v2468_v58  ;;  %v2652_v56 = vpop.permute.xlu0 %2651  ;;  %v2509_v24 = vpack.c.bf16 %v2505_v5, %v2503_v18  ;;  %v1602_v9 = vsel %vm723_vm10, %v1601_v51, %v4322_v44  ;;  %v2247_v49 = vsel %vm723_vm10, %v2246_v52, %v4321_v10  ;;  %v6487_v51 = vld [vmem:[#allocation8_spill] sm:$0xff] }
 0x306   : > { %v740_v27 = vsel %vm739_vm5, %v5749_v17, %v6482_v20  ;;  %v6483_v54 = vunpack.i.h.bf16 %v5651_v62  ;;  %v2035_v33 = vsel %vm731_vm14, %v5834_v4, %v4256_v42  ;;  %v1603_v8 = vsel %vm725_vm11, %v1602_v9, %v4392_v45  ;;  %v6491_v9 = vld [vmem:[#allocation15_spill] sm:$0xff] }
 0x307   : > { %v2525_v53 = vsel %vm2523_vm0, %v2510_v7, 0  ;;  %v2248_v14 = vsel %vm725_vm11, %v2247_v49, %v4391_v28  ;;  %v1394_v17 = vsel %vm739_vm5, %v5752_v6, %v4161_v3  ;;  %v4297_v48 = vunpack.i.h.bf16 %v5667_v59 }
 0x308   : > { %v1822_v36 = vsel %vm731_vm14, %v1821_v19, %v6483_v54  ;;  %2541 = vmatpush1.bf16.msra.mxu1 %v2525_v53  ;;  %v4332_v29 = vunpack.i.h.bf16 %v6484_v35  ;;  %v4331_v50 = vunpack.i.l.bf16 %v6484_v35  ;;  %v4406_v62 = vunpack.i.l.bf16 %v4405_v15  ;;  %v4410_v38 = vpop.permute.xlu1 %4409 }
 0x309   : > { %2542 = vmatprep.subr.bf16.mxu1 %v2509_v24  ;;  %v4296_v26 = vunpack.i.l.bf16 %v5667_v59  ;;  %v4412_v4 = vunpack.i.h.bf16 %v4410_v38  ;;  %v4411_v25 = vunpack.i.l.bf16 %v4410_v38  ;;  %v2658_v1 = vpop.permute.xlu0 %2657  ;;  %v1823_v16 = vsel %vm733_vm15, %v1822_v36, %v4337_v12 }
 0x30a   : > { %v1604_v6 = vsel %vm727_vm12, %v1603_v8, %v4332_v29  ;;  %v2249_v57 = vsel %vm727_vm12, %v2248_v14, %v4331_v50  ;;  %v3007_v34 = vcombine.low %v6485_v37, %v2658_v1  ;;  %v3008_v40 = vcombine.high %v6485_v37, %v2658_v1 }
 0x30b   : > { %v1179_v11 = vsel %vm735_vm3, %v5686_v55, %v6486_v47  ;;  %v4407_v59 = vunpack.i.h.bf16 %v4405_v15  ;;  %v1605_v43 = vsel %vm729_vm13, %v1604_v6, %v4412_v4  ;;  %v2250_v31 = vsel %vm729_vm13, %v2249_v57, %v4411_v25  ;;  %v6490_v15 = vld [vmem:[#allocation16_spill] sm:$0xff] }
 0x30c   : > { %v1395_v63 = vsel %vm741_vm6, %v1394_v17, %v4406_v62  ;;  %v1606_v12 = vsel %vm731_vm14, %v1605_v43, %v4297_v48  ;;  %v2251_v13 = vsel %vm731_vm14, %v2250_v31, %v4296_v26  ;;  %v1164_v30 = vpop.permute.xlu1 %1163  ;;  %v2487_v23 = vrot.slane %v1823_v16, 4  ;;  %v6492_v17 = vld [vmem:[#allocation9_spill] sm:$0xff] }
 0x30d   : > { %v3015_v52 = vrot.slane %v3007_v34, %v6487_v51  ;;  %v3022_v39 = vrot.slane %v3008_v40, %v6487_v51  ;;  %v2664_v2 = vpop.permute.xlu0 %2663  ;;  %v1607_v55 = vsel %vm733_vm15, %v1606_v12, %v4342_v32  ;;  %v6488_v5 = vunpack.i.l.bf16 %v5765_v41  ;;  %v2512_v40 = vld [vmem:[%s6397_s3] sm:$0x3] }
 0x30e   : > { %v3023_v45 = vcombine.low %v2652_v56, %v2664_v2  ;;  %v3024_v28 = vcombine.high %v2652_v56, %v2664_v2  ;;  %v2502_v58 = vsel %vm2497_vm1, %v1607_v55, %v2487_v23  ;;  %v6489_v44 = vunpack.i.l.bf16 %v5676_v22 }
 0x30f   : > { %v2252_v19 = vsel %vm733_vm15, %v2251_v13, %v6488_v5  ;;  %v1180_v7 = vsel %vm737_vm4, %v1179_v11, %v6490_v15  ;;  %v742_v18 = vsel %vm741_vm6, %v740_v27, %v4407_v59  ;;  %v2482_v56 = vrot.slane %v1395_v63, 4  ;;  %v6493_v11 = vld [vmem:[#allocation11_spill] sm:$0xff] }
 0x310   : > { %v2493_v61 = vrot.slane %v2252_v19, 4  ;;  %v2036_v10 = vsel %vm733_vm15, %v2035_v33, %v6489_v44  ;;  %v1181_v32 = vsel %vm739_vm5, %v1180_v7, %v1164_v30  ;;  %v3031_v41 = vrot.slane %v3023_v45, %v6487_v51  ;;  %v1168_v42 = vpop.permute.xlu1 %1167 }
 0x311   : > { %v3038_v3 = vrot.slane %v3024_v28, %v6487_v51  ;;  %v1182_v24 = vsel %vm741_vm6, %v1181_v32, %v1168_v42  ;;  %v2476_v49 = vrot.slane %v6491_v9, 4  ;;  %v2670_v53 = vpop.permute.xlu0 %2669 }
 0x312   : > { %v2504_v20 = vsel %vm2497_vm1, %v2036_v10, %v2493_v61  ;;  %v3071_v54 = vcombine.low %v3015_v52, %v3031_v41  ;;  %v3072_v36 = vcombine.high %v3015_v52, %v3031_v41  ;;  %v2501_v8 = vsel %vm2497_vm1, %v1182_v24, %v2482_v56 }
 0x313   : > { %v2508_v22 = vpack.c.bf16 %v2504_v20, %v2502_v58  ;;  %v3087_v33 = vcombine.low %v3022_v39, %v3038_v3  ;;  %v3088_v27 = vcombine.high %v3022_v39, %v3038_v3  ;;  %v2499_v14 = vsel %vm2497_vm1, %v742_v18, %v2476_v49 }
 0x314   : > { %v3079_v48 = vrot.slane %v3071_v54, %v6492_v17  ;;  %v3086_v35 = vrot.slane %v3072_v36, %v6492_v17  ;;  %v2650_v62 = vpop.permute.xlu1 %2649  ;;  %v2507_v38 = vpack.c.bf16 %v2501_v8, %v2499_v14  ;;  %vm2594_vm1 = vcmask 31744  }
 0x315   : > { %2543 = vmatpush1.bf16.msra.mxu1 %v2508_v22  ;;  %v3095_v29 = vrot.slane %v3087_v33, %v6492_v17  ;;  %v3102_v50 = vrot.slane %v3088_v27, %v6492_v17  ;;  %v2676_v26 = vpop.permute.xlu0 %2675 }
 0x316   : > { %v4048_v4 = vcombine.low %v3079_v48, %v3086_v35  ;;  %v4050_v25 = vcombine.high %v3079_v48, %v3086_v35  ;;  %2544 = vmatprep.subr.bf16.mxu1 %v2507_v38 }
 0x317   : > { %v4052_v1 = vcombine.low %v3095_v29, %v3102_v50  ;;  %v4054_v16 = vcombine.high %v3095_v29, %v3102_v50 }
 0x318   : > { %v3423_v6 = vrot.slane %v4048_v4, %v6487_v51  ;;  %v3439_v57 = vrot.slane %v4050_v25, %v6487_v51  ;;  %v2656_v47 = vpop.permute.xlu1 %2655  ;;  %v2578_v4 = vld [vmem:[%s6400_s6 + $0x8] sm:$0xff] }
 0x319   : > { %v3455_v37 = vrot.slane %v4052_v1, %v6487_v51  ;;  %v3471_v34 = vrot.slane %v4054_v16, %v6487_v51  ;;  %2545 = vmatpush1.bf16.msra.mxu1 %v2506_v46  ;;  %v2735_v59 = vcombine.low %v6493_v11, %v2656_v47  ;;  %v2736_v43 = vcombine.high %v6493_v11, %v2656_v47  ;;  %v2682_v31 = vpop.permute.xlu0 %2681 }
 0x31a   : > { %v3479_v63 = vcombine.low %v3423_v6, %v3439_v57  ;;  %v3480_v13 = vcombine.high %v3423_v6, %v3439_v57  ;;  %v3039_v52 = vcombine.low %v2670_v53, %v2682_v31  ;;  %v3040_v60 = vcombine.high %v2670_v53, %v2682_v31 }
 0x31b   : > { %v3511_v12 = vcombine.low %v3455_v37, %v3471_v34  ;;  %v3512_v30 = vcombine.high %v3455_v37, %v3471_v34  ;;  %v2743_v23 = vrot.slane %v2735_v59, %v6487_v51  ;;  %v2750_v5 = vrot.slane %v2736_v43, %v6487_v51 }
 0x31c   : > { %4036 = vmatmul.mubr.msk.bf16.vlgmr.msra.gmra.mxu1 %vm2519_vm2, %v2512_v40  ;;  %v6061_v21 = vrot.slane %v3479_v63, %v6492_v17  ;;  %v6067_v39 = vrot.slane %v3480_v13, %v6492_v17  ;;  %v2662_v55 = vpop.permute.xlu1 %2661  ;;  %v3047_v28 = vrot.slane %v3039_v52, %v6487_v51  ;;  %v3054_v44 = vrot.slane %v3040_v60, %v6487_v51 }
 0x31d   : > { %v6064_v46 = vrot.slane %v3511_v12, %v6492_v17  ;;  %v6070_v2 = vrot.slane %v3512_v30, %v6492_v17  ;;  %v2751_v19 = vcombine.low %v2650_v62, %v2662_v55  ;;  %v2752_v45 = vcombine.high %v2650_v62, %v2662_v55  ;;  %v2688_v61 = vpop.permute.xlu0 %2687 }
 0x31e   : > { %v3055_v10 = vcombine.low %v2676_v26, %v2688_v61  ;;  %v3056_v15 = vcombine.high %v2676_v26, %v2688_v61 }
 0x31f   : > { %v3544_v58 = vcombine.high %v6061_v21, %v6064_v46  ;;  %v2759_v7 = vrot.slane %v2751_v19, %v6487_v51  ;;  %v2766_v18 = vrot.slane %v2752_v45, %v6487_v51  ;;  %v3543_v32 = vcombine.low %v6061_v21, %v6064_v46  ;;  %v6494_v19 = vld [vmem:[#allocation12_spill] sm:$0xff] }
 0x320   : > { %v3545_v41 = vcombine.low %v6067_v39, %v6070_v2  ;;  %v2668_v3 = vpop.permute.xlu1 %2667  ;;  %v3063_v42 = vrot.slane %v3055_v10, %v6487_v51  ;;  %v3070_v20 = vrot.slane %v3056_v15, %v6487_v51  ;;  %v3546_v56 = vcombine.high %v6067_v39, %v6070_v2 }
 0x321   : > { %3791 = vrot.lane.b32.xlu0 %v3544_v58, %s4536_s9  ;;  %v2799_v24 = vcombine.low %v2743_v23, %v2759_v7  ;;  %v2800_v22 = vcombine.high %v2743_v23, %v2759_v7  ;;  %v2815_v9 = vcombine.low %v2750_v5, %v2766_v18  ;;  %v2816_v49 = vcombine.high %v2750_v5, %v2766_v18  ;;  %v6088_v53 = vpop.permute.xlu0 %2695 }
 0x322   : > { %v3103_v54 = vcombine.low %v3047_v28, %v3063_v42  ;;  %v3104_v36 = vcombine.high %v3047_v28, %v3063_v42  ;;  %v3119_v33 = vcombine.low %v3054_v44, %v3070_v20  ;;  %v3120_v27 = vcombine.high %v3054_v44, %v3070_v20 }
 0x323   : > { %v2807_v8 = vrot.slane %v2799_v24, %v6492_v17  ;;  %v2814_v14 = vrot.slane %v2800_v22, %v6492_v17  ;;  %v2823_v48 = vrot.slane %v2815_v9, %v6492_v17  ;;  %v2830_v35 = vrot.slane %v2816_v49, %v6492_v17 }
 0x324   : > { %v2674_v29 = vpop.permute.xlu1 %2673  ;;  %v3111_v50 = vrot.slane %v3103_v54, %v6492_v17  ;;  %v3118_v62 = vrot.slane %v3104_v36, %v6492_v17  ;;  %v3127_v38 = vrot.slane %v3119_v33, %v6492_v17  ;;  %v3134_v26 = vrot.slane %v3120_v27, %v6492_v17 }
 0x325   : > { %3799 = vrot.lane.b32.xlu0 %v3545_v41, %s4530_s23  ;;  %v4040_v25 = vcombine.low %v2807_v8, %v2814_v14  ;;  %v4042_v1 = vcombine.high %v2807_v8, %v2814_v14  ;;  %v4044_v16 = vcombine.low %v2823_v48, %v2830_v35  ;;  %v4046_v6 = vcombine.high %v2823_v48, %v2830_v35  ;;  %v2702_v57 = vpop.permute.xlu0 %2701 }
 0x326   : > { %v4049_v37 = vcombine.low %v3111_v50, %v3118_v62  ;;  %v4051_v34 = vcombine.high %v3111_v50, %v3118_v62  ;;  %v4053_v40 = vcombine.low %v3127_v38, %v3134_v26  ;;  %v4055_v47 = vcombine.high %v3127_v38, %v3134_v26 }
 0x327   : > { %v3287_v11 = vrot.slane %v4040_v25, %v6487_v51  ;;  %v3303_v59 = vrot.slane %v4042_v1, %v6487_v51  ;;  %v3319_v43 = vrot.slane %v4044_v16, %v6487_v51  ;;  %v3335_v31 = vrot.slane %v4046_v6, %v6487_v51 }
 0x328   : > { %v2680_v63 = vpop.permute.xlu1 %2679  ;;  %v6107_v12 = vrot.slane %v4049_v37, %v6487_v51  ;;  %v6110_v13 = vrot.slane %v4051_v34, %v6487_v51  ;;  %v6113_v30 = vrot.slane %v4053_v40, %v6487_v51  ;;  %v6116_v23 = vrot.slane %v4055_v47, %v6487_v51  ;;  %v2577_v47 = vld [vmem:[%s6400_s6] sm:$0xff] }
 0x329   : > { %2586 = vperm.xlu0 %4152, %v2578_v4   ;;  %v3343_v52 = vcombine.low %v3287_v11, %v3303_v59  ;;  %v3375_v60 = vcombine.low %v3319_v43, %v3335_v31  ;;  %v2767_v39 = vcombine.low %v2668_v3, %v2680_v63  ;;  %v2768_v2 = vcombine.high %v2668_v3, %v2680_v63  ;;  %v2708_v61 = vpop.permute.xlu0 %2707 }
 0x32a   : > { %v3344_v55 = vcombine.high %v3287_v11, %v3303_v59  ;;  %v3376_v5 = vcombine.high %v3319_v43, %v3335_v31  ;;  %v3143_v45 = vcombine.low %v6494_v19, %v2702_v57  ;;  %v3144_v28 = vcombine.high %v6494_v19, %v2702_v57 }
 0x32b   : > { %v6121_v58 = vrot.slane %v3343_v52, %v6492_v17  ;;  %v6124_v44 = vrot.slane %v3375_v60, %v6492_v17  ;;  %v2775_v10 = vrot.slane %v2767_v39, %v6487_v51  ;;  %v2782_v15 = vrot.slane %v2768_v2, %v6487_v51 }
 0x32c   : > { %v6129_v7 = vrot.slane %v3344_v55, %v6492_v17  ;;  %v6132_v18 = vrot.slane %v3376_v5, %v6492_v17  ;;  %v2686_v41 = vpop.permute.xlu1 %2685  ;;  %v3151_v3 = vrot.slane %v3143_v45, %v6487_v51  ;;  %v3158_v42 = vrot.slane %v3144_v28, %v6487_v51  ;;  %v6495_v55 = vld [vmem:[#allocation14_spill] sm:$0xff] }
 0x32d   : > { %3807 = vrot.lane.b32.xlu0 %v3546_v56, %s4537_s21  ;;  %v3408_v20 = vcombine.high %v6121_v58, %v6124_v44  ;;  %v2783_v24 = vcombine.low %v2674_v29, %v2686_v41  ;;  %v2784_v22 = vcombine.high %v2674_v29, %v2686_v41  ;;  %v3159_v9 = vcombine.low %v6088_v53, %v2708_v61 }
 0x32e   : > { %v3409_v49 = vcombine.low %v6129_v7, %v6132_v18  ;;  %v3160_v54 = vcombine.high %v6088_v53, %v2708_v61  ;;  %v3410_v36 = vcombine.high %v6129_v7, %v6132_v18  ;;  %v3495_v33 = vcombine.low %v6107_v12, %v6110_v13 }
 0x32f   : > { %3789 = vrot.lane.b32.xlu1 %v3408_v20, %s4536_s9  ;;  %v2791_v56 = vrot.slane %v2783_v24, %v6487_v51  ;;  %v2798_v27 = vrot.slane %v2784_v22, %v6487_v51  ;;  %v3167_v8 = vrot.slane %v3159_v9, %v6487_v51  ;;  %v3527_v14 = vcombine.low %v6113_v30, %v6116_v23 }
 0x330   : > { %v2694_v48 = vpop.permute.xlu1 %2693  ;;  %v3174_v53 = vrot.slane %v3160_v54, %v6487_v51  ;;  %v6155_v35 = vrot.slane %v3495_v33, %v6492_v17  ;;  %v3496_v29 = vcombine.high %v6107_v12, %v6110_v13  ;;  %v3528_v50 = vcombine.high %v6113_v30, %v6116_v23 }
 0x331   : > { %v2831_v62 = vcombine.low %v2775_v10, %v2791_v56  ;;  %v2832_v38 = vcombine.high %v2775_v10, %v2791_v56  ;;  %v2847_v26 = vcombine.low %v2782_v15, %v2798_v27  ;;  %v2848_v4 = vcombine.high %v2782_v15, %v2798_v27 }
 0x332   : > { %v3207_v25 = vcombine.low %v3151_v3, %v3167_v8  ;;  %v3208_v1 = vcombine.high %v3151_v3, %v3167_v8  ;;  %v3223_v16 = vcombine.low %v3158_v42, %v3174_v53  ;;  %v3224_v6 = vcombine.high %v3158_v42, %v3174_v53 }
 0x333   : > { %3797 = vrot.lane.b32.xlu1 %v3409_v49, %s4530_s23  ;;  %v2839_v57 = vrot.slane %v2831_v62, %v6492_v17  ;;  %v2846_v37 = vrot.slane %v2832_v38, %v6492_v17  ;;  %v2855_v34 = vrot.slane %v2847_v26, %v6492_v17  ;;  %v2862_v40 = vrot.slane %v2848_v4, %v6492_v17  ;;  %s6498_s23 = smov 126  }
 0x334   : > { %v2700_v11 = vpop.permute.xlu1 %2699  ;;  %v3215_v59 = vrot.slane %v3207_v25, %v6492_v17  ;;  %v3222_v43 = vrot.slane %v3208_v1, %v6492_v17  ;;  %v3231_v31 = vrot.slane %v3223_v16, %v6492_v17  ;;  %v3238_v63 = vrot.slane %v3224_v6, %v6492_v17 }
 0x335   : > { %v4041_v52 = vcombine.low %v2839_v57, %v2846_v37  ;;  %v4043_v60 = vcombine.high %v2839_v57, %v2846_v37  ;;  %v4045_v39 = vcombine.low %v2855_v34, %v2862_v40  ;;  %v4047_v2 = vcombine.high %v2855_v34, %v2862_v40 }
 0x336   : > { %v2871_v5 = vcombine.low %v6495_v55, %v2700_v11  ;;  %v2872_v19 = vcombine.high %v6495_v55, %v2700_v11  ;;  %v4064_v45 = vcombine.low %v3215_v59, %v3222_v43  ;;  %v4066_v28 = vcombine.high %v3215_v59, %v3222_v43 }
 0x337   : > { %v3294_v61 = vrot.slane %v4041_v52, %v6487_v51  ;;  %v3310_v10 = vrot.slane %v4043_v60, %v6487_v51  ;;  %v3326_v15 = vrot.slane %v4045_v39, %v6487_v51  ;;  %v3342_v7 = vrot.slane %v4047_v2, %v6487_v51  ;;  %2581 = vperm.xlu1 %4413, %v2577_v47  }
 0x338   : > { %v2879_v18 = vrot.slane %v2871_v5, %v6487_v51  ;;  %v2886_v41 = vrot.slane %v2872_v19, %v6487_v51  ;;  %v2706_v3 = vpop.permute.xlu1 %2705  ;;  %v6182_v42 = vrot.slane %v4064_v45, %v6487_v51  ;;  %v6185_v20 = vrot.slane %v4066_v28, %v6487_v51 }
 0x339   : > { %v2887_v24 = vcombine.low %v2694_v48, %v2706_v3  ;;  %v2888_v22 = vcombine.high %v2694_v48, %v2706_v3  ;;  %v4068_v9 = vcombine.low %v3231_v31, %v3238_v63  ;;  %v4070_v49 = vcombine.high %v3231_v31, %v3238_v63 }
 0x33a   : > { %v3359_v54 = vcombine.low %v3294_v61, %v3310_v10  ;;  %v3391_v33 = vcombine.low %v3326_v15, %v3342_v7  ;;  %v3535_v56 = vrot.slane %v3527_v14, %v6492_v17  ;;  %v3360_v27 = vcombine.high %v3294_v61, %v3310_v10  ;;  %v6197_v14 = vpop.permute.xlu0 %2713 }
 0x33b   : > { %v2895_v8 = vrot.slane %v2887_v24, %v6487_v51  ;;  %v2902_v53 = vrot.slane %v2888_v22, %v6487_v51  ;;  %v3709_v62 = vrot.slane %v4068_v9, %v6487_v51  ;;  %v3725_v38 = vrot.slane %v4070_v49, %v6487_v51  ;;  %3805 = vrot.lane.b32.xlu1 %v3410_v36, %s4537_s21  ;;  %s6497_s21 = smov 84  }
 0x33c   : > { %v3367_v26 = vrot.slane %v3359_v54, %v6492_v17  ;;  %v3399_v48 = vrot.slane %v3391_v33, %v6492_v17  ;;  %v3547_v4 = vcombine.low %v6155_v35, %v3535_v56  ;;  %v3548_v25 = vcombine.high %v6155_v35, %v3535_v56  ;;  %v6199_v37 = vpop.permute.xlu1 %2711 }
 0x33d   : > { %v2935_v1 = vcombine.low %v2879_v18, %v2895_v8  ;;  %v2936_v16 = vcombine.high %v2879_v18, %v2895_v8  ;;  %v2951_v6 = vcombine.low %v2886_v41, %v2902_v53  ;;  %v2952_v57 = vcombine.high %v2886_v41, %v2902_v53 }
 0x33e   : > { %v3411_v34 = vcombine.low %v3367_v26, %v3399_v48  ;;  %3815 = vrot.lane.b32.xlu0 %v3547_v4, %s4532_s11  ;;  %v3412_v36 = vcombine.high %v3367_v26, %v3399_v48  ;;  %v6203_v40 = vrot.slane %v3360_v27, %v6492_v17  ;;  %v3392_v47 = vcombine.high %v3326_v15, %v3342_v7  ;;  %v2720_v13 = vpop.permute.xlu0 %2719 }
 0x33f   : > { %v2943_v11 = vrot.slane %v2935_v1, %v6492_v17  ;;  %v2950_v35 = vrot.slane %v2936_v16, %v6492_v17  ;;  %v2959_v59 = vrot.slane %v2951_v6, %v6492_v17  ;;  %v2966_v43 = vrot.slane %v2952_v57, %v6492_v17 }
 0x340   : > { %3813 = vrot.lane.b32.xlu1 %v3411_v34, %s4532_s11  ;;  %v6211_v31 = vrot.slane %v3392_v47, %v6492_v17  ;;  %v3510_v63 = vrot.slane %v3496_v29, %v6492_v17  ;;  %v3542_v52 = vrot.slane %v3528_v50, %v6492_v17  ;;  %v3733_v60 = vcombine.low %v6182_v42, %v6185_v20  ;;  %s6496_s11 = smov 70   ;;  %v2718_v28 = vpop.permute.xlu1 %2717 }
 0x341   : > { %v4056_v39 = vcombine.low %v2943_v11, %v2950_v35  ;;  %v4058_v2 = vcombine.high %v2943_v11, %v2950_v35  ;;  %v4060_v55 = vcombine.low %v2959_v59, %v2966_v43  ;;  %v4062_v5 = vcombine.high %v2959_v59, %v2966_v43 }
 0x342   : > { %3823 = vrot.lane.b32.xlu0 %v3548_v25, %s6496_s11  ;;  %v3549_v19 = vcombine.low %v3510_v63, %v3542_v52  ;;  %v6225_v45 = vrot.slane %v3733_v60, %v6492_v17  ;;  %v3757_v12 = vcombine.low %v3709_v62, %v3725_v38  ;;  %v3413_v61 = vcombine.low %v6203_v40, %v6211_v31  ;;  %v2726_v56 = vpop.permute.xlu0 %2725 }
 0x343   : > { %v3559_v29 = vrot.slane %v4056_v39, %v6487_v51  ;;  %v3575_v30 = vrot.slane %v4058_v2, %v6487_v51  ;;  %v3591_v23 = vrot.slane %v4060_v55, %v6487_v51  ;;  %v3607_v50 = vrot.slane %v4062_v5, %v6487_v51 }
 0x344   : > { %3821 = vrot.lane.b32.xlu1 %v3412_v36, %s6496_s11  ;;  %v3765_v10 = vrot.slane %v3757_v12, %v6492_v17  ;;  %v3734_v15 = vcombine.high %v6182_v42, %v6185_v20  ;;  %v3758_v7 = vcombine.high %v3709_v62, %v3725_v38  ;;  %v2724_v8 = vpop.permute.xlu1 %2723  ;;  %v3407_v38 = vcombine.low %v6121_v58, %v6124_v44  ;;  %s4078_s11 = sshll.u32 %s4603_s28, 9 }
 0x345   : > { %v3615_v18 = vcombine.low %v3559_v29, %v3575_v30  ;;  %v3639_v41 = vcombine.low %v3591_v23, %v3607_v50  ;;  %v3616_v3 = vcombine.high %v3559_v29, %v3575_v30  ;;  %v3640_v24 = vcombine.high %v3591_v23, %v3607_v50 }
 0x346   : > { %3831 = vrot.lane.b32.xlu0 %v3549_v19, %s6497_s21  ;;  %v3782_v22 = vcombine.high %v6225_v45, %v3765_v10  ;;  %v3748_v9 = vrot.slane %v3734_v15, %v6492_v17  ;;  %v3772_v49 = vrot.slane %v3758_v7, %v6492_v17  ;;  %v3414_v26 = vcombine.high %v6203_v40, %v6211_v31  ;;  %v2732_v4 = vpop.permute.xlu0 %2731 }
 0x347   : > { %v3623_v54 = vrot.slane %v3615_v18, %v6492_v17  ;;  %v3647_v33 = vrot.slane %v3639_v41, %v6492_v17  ;;  %v3630_v42 = vrot.slane %v3616_v3, %v6492_v17  ;;  %v3654_v20 = vrot.slane %v3640_v24, %v6492_v17 }
 0x348   : > { %3829 = vrot.lane.b32.xlu1 %v3413_v61, %s6497_s21  ;;  %v3783_v53 = vcombine.low %v3748_v9, %v3772_v49  ;;  %v3550_v48 = vcombine.high %v3510_v63, %v3542_v52  ;;  %v3175_v25 = vcombine.low %v6197_v14, %v2726_v56  ;;  %v3176_v1 = vcombine.high %v6197_v14, %v2726_v56  ;;  %v2730_v57 = vpop.permute.xlu1 %2729 }
 0x349   : > { %v3664_v27 = vcombine.high %v3623_v54, %v3647_v33  ;;  %v3665_v62 = vcombine.low %v3630_v42, %v3654_v20  ;;  %v3191_v16 = vcombine.low %v2720_v13, %v2732_v4  ;;  %v3192_v6 = vcombine.high %v2720_v13, %v2732_v4 }
 0x34a   : > { %3855 = vrot.lane.b32.xlu0 %v3782_v22, %s6498_s23  ;;  %v2903_v34 = vcombine.low %v6199_v37, %v2724_v8  ;;  %v2904_v36 = vcombine.high %v6199_v37, %v2724_v8  ;;  %v2919_v47 = vcombine.low %v2718_v28, %v2730_v57  ;;  %v2920_v11 = vcombine.high %v2718_v28, %v2730_v57 }
 0x34b   : > { %v3666_v40 = vcombine.high %v3630_v42, %v3654_v20  ;;  %v3784_v35 = vcombine.high %v3748_v9, %v3772_v49  ;;  %v3183_v59 = vrot.slane %v3175_v25, %v6487_v51  ;;  %v3190_v43 = vrot.slane %v3176_v1, %v6487_v51 }
 0x34c   : > { %3853 = vrot.lane.b32.xlu1 %v3664_v27, %s6498_s23  ;;  %v3199_v14 = vrot.slane %v3191_v16, %v6487_v51  ;;  %v3206_v31 = vrot.slane %v3192_v6, %v6487_v51  ;;  %v2911_v63 = vrot.slane %v2903_v34, %v6487_v51  ;;  %v2918_v37 = vrot.slane %v2904_v36, %v6487_v51 }
 0x34d   : > { %v2927_v52 = vrot.slane %v2919_v47, %v6487_v51  ;;  %v2934_v60 = vrot.slane %v2920_v11, %v6487_v51  ;;  %v3663_v39 = vcombine.low %v3623_v54, %v3647_v33  ;;  %v3781_v2 = vcombine.low %v6225_v45, %v3765_v10 }
 0x34e   : > { %3863 = vrot.lane.b32.xlu0 %v3783_v53, %s6499_s22  ;;  %v3239_v55 = vcombine.low %v3183_v59, %v3199_v14  ;;  %v3240_v5 = vcombine.high %v3183_v59, %v3199_v14  ;;  %v3255_v19 = vcombine.low %v3190_v43, %v3206_v31  ;;  %v3256_v12 = vcombine.high %v3190_v43, %v3206_v31 }
 0x34f   : > { %v2967_v13 = vcombine.low %v2911_v63, %v2927_v52  ;;  %v2968_v29 = vcombine.high %v2911_v63, %v2927_v52  ;;  %v2983_v30 = vcombine.low %v2918_v37, %v2934_v60  ;;  %v2984_v23 = vcombine.high %v2918_v37, %v2934_v60 }
 0x350   : > { %3861 = vrot.lane.b32.xlu1 %v3665_v62, %s6499_s22  ;;  %v3247_v50 = vrot.slane %v3239_v55, %v6492_v17  ;;  %v3254_v28 = vrot.slane %v3240_v5, %v6492_v17  ;;  %v3263_v61 = vrot.slane %v3255_v19, %v6492_v17  ;;  %v3270_v45 = vrot.slane %v3256_v12, %v6492_v17  ;;  %s6349_s22 = scalar_lea.hbm %s6401_s7, %s4078_s11 }
 0x351   : > { %v2975_v10 = vrot.slane %v2967_v13, %v6492_v17  ;;  %v2982_v15 = vrot.slane %v2968_v29, %v6492_v17  ;;  %v2991_v7 = vrot.slane %v2983_v30, %v6492_v17  ;;  %v2998_v18 = vrot.slane %v2984_v23, %v6492_v17 }
 0x352   : > { %3839 = vrot.lane.b32.xlu0 %v3550_v48, %s6500_s15  ;;  %v4065_v41 = vcombine.low %v3247_v50, %v3254_v28  ;;  %v4067_v3 = vcombine.high %v3247_v50, %v3254_v28  ;;  %v4069_v24 = vcombine.low %v3263_v61, %v3270_v45  ;;  %v4071_v22 = vcombine.high %v3263_v61, %v3270_v45 }
 0x353   : > { %v4057_v9 = vcombine.low %v2975_v10, %v2982_v15  ;;  %v4059_v49 = vcombine.high %v2975_v10, %v2982_v15  ;;  %v4061_v54 = vcombine.low %v2991_v7, %v2998_v18  ;;  %v4063_v33 = vcombine.high %v2991_v7, %v2998_v18 }
 0x354   : > { %3837 = vrot.lane.b32.xlu1 %v3414_v26, %s6500_s15  ;;  %v3684_v42 = vrot.slane %v4065_v41, %v6487_v51  ;;  %v3700_v20 = vrot.slane %v4067_v3, %v6487_v51  ;;  %v3716_v56 = vrot.slane %v4069_v24, %v6487_v51  ;;  %v3732_v27 = vrot.slane %v4071_v22, %v6487_v51  ;;  %s3931_s15 = scalar_lea.sflag [#allocation4], %s4679_s17 }
 0x355   : > { %v3566_v8 = vrot.slane %v4057_v9, %v6487_v51  ;;  %v3582_v53 = vrot.slane %v4059_v49, %v6487_v51  ;;  %v3598_v62 = vrot.slane %v4061_v54, %v6487_v51  ;;  %v3614_v26 = vrot.slane %v4063_v33, %v6487_v51 }
 0x356   : > { %3871 = vrot.lane.b32.xlu0 %v3784_v35, %s6501_s29  ;;  %v3749_v25 = vcombine.low %v3684_v42, %v3700_v20  ;;  %v3773_v1 = vcombine.low %v3716_v56, %v3732_v27 }
 0x357   : > { %v3631_v48 = vcombine.low %v3566_v8, %v3582_v53  ;;  %v3655_v4 = vcombine.low %v3598_v62, %v3614_v26 }
 0x358   : > { %3869 = vrot.lane.b32.xlu1 %v3666_v40, %s6501_s29  ;;  %v3756_v57 = vrot.slane %v3749_v25, %v6492_v17  ;;  %v3780_v34 = vrot.slane %v3773_v1, %v6492_v17  ;;  %s4540_s29 = smov [#allocation5]  }
 0x359   : > { %v3638_v16 = vrot.slane %v3631_v48, %v6492_v17  ;;  %v3662_v6 = vrot.slane %v3655_v4, %v6492_v17 }
 0x35a   : > { %3847 = vrot.lane.b32.xlu0 %v3781_v2, %s4518_s19  ;;  %v3785_v47 = vcombine.low %v3756_v57, %v3780_v34  ;;  %v3786_v51 = vcombine.high %v3756_v57, %v3780_v34 }
 0x35b   : > { %v3667_v36 = vcombine.low %v3638_v16, %v3662_v6  ;;  %v3668_v11 = vcombine.high %v3638_v16, %v3662_v6 }
 0x35c   : > { %3845 = vrot.lane.b32.xlu1 %v3663_v39, %s4518_s19  ;;  %s6502_s19 = smov 40   ;;  %v4414_v39 = vld [vmem:[%s6399_s5] sm:$0xff]  }
 0x35e   : > { %3879 = vrot.lane.b32.xlu0 %v3785_v47, %s6502_s19 }
 0x360   : > { %3877 = vrot.lane.b32.xlu1 %v3667_v36, %s6502_s19  ;;  %s4451_s19 = sshll.u32 %s4540_s29, 4  ;;  %s4452_s19 = int_to_ptr.vmem [resolvable:$false] %s4451_s19 }
 0x361   : > { %s4453_s8 = scalar_lea.vmem %s4452_s19, 1024 }
 0x362   : > { %3887 = vrot.lane.b32.xlu0 %v3786_v51, %s4539_s12 }
 0x364   : > { %3885 = vrot.lane.b32.xlu1 %v3668_v11, %s4539_s12  ;;  %s6503_s12 = sshll.u32 %s4679_s17, 5 }
 0x365   : > { %s296_s9 = scalar_lea.vmem [#allocation5], %s6503_s12 }
 0x366   : > { %s3944_s18 = sshll.u32 %s296_s9, 4  ;;  %s6344_s18 = int_to_ptr.vmem [resolvable:$true] %s3944_s18 }
 0x367   : > { %s4447_s28 = scalar_lea.vmem %s6344_s18, 512  ;;  %p4454_p5 = scmp.lt.s32.totalorder %s6344_s18, %s4452_s19 }
 0x368   : > { %p4448_p11 = scmp.ne.s32.totalorder %s6344_s18, %s4447_s28  ;;  %p4455_p7 = scmp.lt.s32.totalorder %s4453_s8, %s4447_s28 }
 0x36a   : > { %p4449_p13 = pnand %p4448_p11, %p6504_p12  ;;  %p4456_p8 = por %p4455_p7, %p4454_p5 }
 0x36c   : > { %p4450_p4 = pneg %p4449_p13 }
 0x36e   : > { %p4457_p10 = pnand %p4456_p8, %p4450_p4 }
 0x393   : > { %v3792_v55 = vpop.permute.xlu0 %3791 }
 0x394   : > { %v3892_v22 = vsel %vm717_vm7, %v3543_v32, %v3792_v55 }
 0x3a1   : > { %v3790_v2 = vpop.permute.xlu1 %3789 }
 0x3a2   : > { %v3891_v41 = vsel %vm717_vm7, %v3407_v38, %v3790_v2 }
 0x3a5   : > { %v3798_v5 = vpop.permute.xlu1 %3797 }
 0x3a6   : > { %v3893_v24 = vsel %vm719_vm8, %v3891_v41, %v3798_v5 }
 0x3b2   : > { %v2582_v19 = vpop.permute.xlu1 %2581 }
 0x3b6   : > { %v3806_v13 = vpop.permute.xlu1 %3805 }
 0x3b7   : > { %v3895_v49 = vsel %vm721_vm9, %v3893_v24, %v3806_v13 }
 0x3ba   : > { %v3814_v30 = vpop.permute.xlu1 %3813 }
 0x3bb   : > { %v3897_v42 = vsel %vm723_vm10, %v3895_v49, %v3814_v30 }
 0x3be   : > { %v3822_v50 = vpop.permute.xlu1 %3821 }
 0x3bf   : > { %v3899_v38 = vsel %vm725_vm11, %v3897_v42, %v3822_v50 }
 0x3c2   : > { %v3830_v61 = vpop.permute.xlu1 %3829 }
 0x3c3   : > { %v3901_v21 = vsel %vm727_vm12, %v3899_v38, %v3830_v61 }
 0x3c6   : > { %v3854_v10 = vpop.permute.xlu1 %3853 }
 0x3ca   : > { %v3862_v7 = vpop.permute.xlu1 %3861 }
 0x3cb   : > { %v3909_v32 = vsel %vm735_vm3, %v3854_v10, %v3862_v7 }
 0x3ce   : > { %v3838_v3 = vpop.permute.xlu1 %3837 }
 0x3cf   : > { %v3903_v53 = vsel %vm729_vm13, %v3901_v21, %v3838_v3 }
 0x3d2   : > { %v3870_v33 = vpop.permute.xlu1 %3869 }
 0x3d3   : > { %v3911_v26 = vsel %vm737_vm4, %v3909_v32, %v3870_v33 }
 0x3d6   : > { %v3846_v56 = vpop.permute.xlu1 %3845 }
 0x3d7   : > { %v3905_v4 = vsel %vm731_vm14, %v3903_v53, %v3846_v56 }
 0x3d8   : > { %v3907_v47 = vsel %vm733_vm15, %v3905_v4, %v3854_v10 }
 0x3da   : > { %v3878_v8 = vpop.permute.xlu1 %3877 }
 0x3db   : > { %v3913_v6 = vsel %vm739_vm5, %v3911_v26, %v3878_v8 }
 0x3dc   : > { %v2564_v40 = vpop.f32.mrf.mxu1 }
 0x3dd   : > { %v2565_v35 = vadd.f32 %v2564_v40, %v5966_v0 }
 0x3de   : > { %v2566_v59 = vpop.f32.mrf.mxu1  ;;  %v3886_v57 = vpop.permute.xlu1 %3885 }
 0x3df   : > { %v2571_v43 = vmax.f32 %v2565_v35, 0.0  ;;  %v2567_v14 = vadd.f32 %v2566_v59, %v5966_v0  ;;  %v3800_v0 = vpop.permute.xlu0 %3799  ;;  %v3915_v59 = vsel %vm741_vm6, %v3913_v6, %v3886_v57 }
 0x3e0   : > { %v2568_v17 = vpop.f32.mrf.mxu1  ;;  %v3894_v54 = vsel %vm719_vm8, %v3892_v22, %v3800_v0 }
 0x3e1   : > { %v2575_v31 = vpack.c.bf16 %v2571_v43, %v2571_v43  ;;  %v2572_v63 = vmax.f32 %v2567_v14, 0.0 }
 0x3e2   : > { %v2569_v37 = vpop.f32.mrf.mxu1 }
 0x3e3   : > { %v2576_v52 = vpack.c.bf16 %v2572_v63, %v2572_v63  ;;  %v2599_v60 = vsel %vm2523_vm0, %v2575_v31, 0  ;;  %v6304_v12 = vpop.permute.xlu0 %2586 }
 0x3e5   : > { %4038 = vmatprep.subr.msk.bf16.mxu0 %vm2523_vm0, %v2576_v52 }
 0x3e6   : > { %2619 = vmatpush1.bf16.msra.mxu0 %v2599_v60 }
 0x3e7   : > { %v3808_v29 = vpop.permute.xlu0 %3807 }
 0x3e8   : > { %v3896_v58 = vsel %vm721_vm9, %v3894_v54, %v3808_v29 }
 0x3e9   : > { %4039 = vmatmul.mubr.msk.bf16.vlgmr.msra.gmra.mxu0 %vm2594_vm1, %v4414_v39 }
 0x3eb   : > { %v3816_v23 = vpop.permute.xlu0 %3815 }
 0x3ec   : > { %v3898_v20 = vsel %vm723_vm10, %v3896_v58, %v3816_v23 }
 0x3ef   : > { %v3824_v28 = vpop.permute.xlu0 %3823 }
 0x3f0   : > { %v3900_v46 = vsel %vm725_vm11, %v3898_v20, %v3824_v28 }
 0x3f3   : > { %v3832_v45 = vpop.permute.xlu0 %3831 }
 0x3f4   : > { %v3902_v62 = vsel %vm727_vm12, %v3900_v46, %v3832_v45 }
 0x3f7   : > { %v3856_v15 = vpop.permute.xlu0 %3855 }
 0x3fb   : > { %v3864_v18 = vpop.permute.xlu0 %3863 }
 0x3fc   : > { %v3910_v48 = vsel %vm735_vm3, %v3856_v15, %v3864_v18  ;;  %vm3926_vm3 = vcmask 556032  }
 0x3ff   : > { %v3840_v9 = vpop.permute.xlu0 %3839 }
 0x400   : > { %v3904_v1 = vsel %vm729_vm13, %v3902_v62, %v3840_v9 }
 0x403   : > { %v3872_v44 = vpop.permute.xlu0 %3871 }
 0x404   : > { %v3912_v36 = vsel %vm737_vm4, %v3910_v48, %v3872_v44 }
 0x407   : > { %v3848_v27 = vpop.permute.xlu0 %3847 }
 0x408   : > { %v3906_v51 = vsel %vm731_vm14, %v3904_v1, %v3848_v27 }
 0x409   : > { %v3908_v52 = vsel %vm733_vm15, %v3906_v51, %v3856_v15 }
 0x40b   : > { %v3880_v25 = vpop.permute.xlu0 %3879 }
 0x40c   : > { %v3914_v14 = vsel %vm739_vm5, %v3912_v36, %v3880_v25 }
 0x40f   : > { %v3888_v17 = vpop.permute.xlu0 %3887 }
 0x410   : > { %v3916_v5 = vsel %vm741_vm6, %v3914_v14, %v3888_v17 }
 0x4a9   : > { %v2638_v16 = vpop.f32.mrf.mxu0 }
 0x4aa   : > { %v2639_v34 = vadd.f32 %v2638_v16, %v2582_v19 }
 0x4ab   : > { %v2640_v11 = vpop.f32.mrf.mxu0 }
 0x4ac   : > { %v3917_v40 = vadd.f32 %v3907_v47, %v2639_v34  ;;  %v2641_v35 = vadd.f32 %v2640_v11, %v2582_v19 }
 0x4ad   : > { %v2642_v43 = vpop.f32.mrf.mxu0 }
 0x4ae   : > { %v3921_v31 = vmax.f32 %v3917_v40, 0.0  ;;  %v3918_v63 = vadd.f32 %v3915_v59, %v2641_v35  ;;  %v2643_v37 = vadd.f32 %v2642_v43, %v6304_v12 }
 0x4af   : > { %v2644_v60 = vpop.f32.mrf.mxu0 }
 0x4b0   : > { %3925 = vst [vmem:[%s296_s9] sm:$0xff] %v3921_v31  ;;  %v3922_v39 = vmax.f32 %v3918_v63, 0.0  ;;  %v3919_v2 = vadd.f32 %v3908_v52, %v2643_v37  ;;  %v2645_v55 = vadd.f32 %v2644_v60, %v6304_v12 }
 0x4b2   : > { %3927 = vst.msk [vmem:[%s296_s9 + $0x8] sm:$0xff] %vm3926_vm3, %v3922_v39  ;;  %v3923_v0 = vmax.f32 %v3919_v2, 0.0  ;;  %v3920_v19 = vadd.f32 %v3916_v5, %v2645_v55 }
 0x4b4   : > { %3928 = vst [vmem:[%s296_s9 + $0x10] sm:$0xff] %v3923_v0  ;;  %v3924_v13 = vmax.f32 %v3920_v19, 0.0 }
 0x4b6   : > { %3929 = vst.msk [vmem:[%s296_s9 + $0x18] sm:$0xff] %vm3926_vm3, %v3924_v13 }
 0x4b7   : > { %4460 = shalt.err (!%p4457_p10)
}
 0x4b8   : > { %s4461_s16 = scalar_lea.hbm %s6349_s22, 512  ;;  %s4465_s11 = scalar_lea.hbm %s6401_s7, 1024 }
 0x4b9   : > { %p4462_p0 = scmp.ne.s32.totalorder %s6349_s22, %s4461_s16  ;;  %p4466_p1 = scmp.lt.s32.totalorder %s6349_s22, %s6401_s7 }
 0x4ba   : > { %p4467_p3 = scmp.lt.s32.totalorder %s4465_s11, %s4461_s16 }
 0x4bb   : > { %p4463_p2 = pnand %p4462_p0, %p6504_p12 }
 0x4bc   : > { %p4468_p6 = por %p4467_p3, %p4466_p1 }
 0x4bd   : > { %p4464_p9 = pneg %p4463_p2 }
 0x4bf   : > { %p4469_p11 = pnand %p4468_p6, %p4464_p9 }
 0x4c1   : > { %4472 = shalt.err (!%p4469_p11)
}
 0x4c2   : > { %s4541_s28 = smov 256  }
 0x4c3   : > { %4081 = dma.vmem_to_hbm [thread:$0]  (%p6504_p12), %s6344_s18, 512, %s6349_s22, %s3931_s15, %s4541_s28, %s4541_s28, %s6466_s20  }
 0x4c4 PF: > { %s3959_s29 = sand.u32 1, %s4499_s24   ;;  %p6505_p13 = scmp.ne.s32.totalorder %s6451_s14, 0 }
 0x4c5   : > { %p6506_p4 = scmp.ge.s32.totalorder %s4511_s27, 2  ;;  %s3960_s19 = scalar_lea.sflag [#allocation4], %s3959_s29 }
 0x4c7   : > { %p4088_p5 = pnand %p6506_p4, %p6505_p13 }
 0x4c9   : > { %p4089_p7 = pneg %p4088_p5 }
 0x4cb   : > { %4494 = dma.done.wait (%p4089_p7), %s3960_s19, 512  }
 0x4cc   : > { %4496 = vsyncadd (%p4089_p7), %s3960_s19, 4294966784  ;;  %p20_p8 = scmp.ge.s32.totalorder %s4607_s30, 4   ;;  %s6507_s24 = smov %s4503_s25 }
 0x4cd   : > { %s6508_s25 = smov %s4507_s26  ;;  %s6509_s26 = smov %s4619_s10 }
 0x4ce   : > { %s6510_s27 = smov %s4607_s30  ;;  %22 = sbr.rel (!%p20_p8) target bundleno = 5 (0x5), region = 93 }
 0x4d3   :  { %3965 = vsyncpa [#allocation3], 1 }
 0x4d4   :  { %3967 = vsyncpa [#allocation3 + $0x1], 1 }
 0x4d5   :  { %3968 = vsyncpa [#allocation4], 1 }
 0x4d6   :  { %3970 = vsyncpa [#allocation4 + $0x1], 1 }

</bundles_post_ra>
